<compile_context>
chip_gen: v7x
topology: tpu7x:2x2x1
jax: 0.10.0
libtpu: 0.0.40
codegen_flags: <defaults>
</compile_context>

<pallas_src>
import math

import jax
import jax.numpy as jnp
from jax import lax
from jax.experimental import pallas as pl
from jax.experimental.pallas import tpu as pltpu


# ----------------------------------------------------------------------------------
# Kernel: serial bidirectional GRU recurrence over one batch block.
# ----------------------------------------------------------------------------------
def _bigru_recurrence_kernel(lens_ref, gif_ref, gib_ref, whf_ref, whb_ref,
                             bhf_ref, bhb_ref, out_ref):
    """Serial part of the packed bidirectional GRU.

    lens_ref : (Bblk, 1)       int32  valid lengths
    gif_ref  : (T, Bblk, 3H)   bf16   precomputed x @ W_ih^f + b_ih^f (forward gates)
    gib_ref  : (T, Bblk, 3H)   bf16   precomputed x @ W_ih^b + b_ih^b (backward gates)
    whf/whb  : (H, 3H)         f32    hidden->gate weights (transposed)
    bhf/bhb  : (1, 3H)         f32    hidden biases
    out_ref  : (T, Bblk, 2H)   f32    fwd hidden in lanes [:H], bwd hidden in lanes [H:]
    """
    T = gif_ref.shape[0]
    Bblk = gif_ref.shape[1]
    H = whf_ref.shape[0]

    # Hoist constant loads out of the time loop.
    lens = lens_ref[...]          # (Bblk, 1) int32
    whf = whf_ref[...]            # (H, 3H) f32
    whb = whb_ref[...]
    bhf = bhf_ref[...]            # (1, 3H) f32
    bhb = bhb_ref[...]

    def gru_cell(gi_t, gh, h_prev):
        # torch.nn.GRU gate order (r, z, n); n = tanh(gi_n + r * (h @ W_hn + b_hn)).
        r = jax.nn.sigmoid(gi_t[:, 0 * H:1 * H] + gh[:, 0 * H:1 * H])
        z = jax.nn.sigmoid(gi_t[:, 1 * H:2 * H] + gh[:, 1 * H:2 * H])
        n = jnp.tanh(gi_t[:, 2 * H:3 * H] + r * gh[:, 2 * H:3 * H])
        return (1.0 - z) * n + z * h_prev

    def body(k, carry):
        h_f, h_b = carry
        tb = T - 1 - k

        # Lane-dense per-direction loads (no unused half of a fused 6H row).
        gi_f = gif_ref[k].astype(jnp.float32)      # (Bblk, 3H)
        gi_b = gib_ref[tb].astype(jnp.float32)     # (Bblk, 3H)

        # f32 x f32 recurrent matmuls (bf16 x bf16 -> f32 dot is rejected by the
        # CPU/interpret executor; the matmul here is tiny so precision is cheap).
        gh_f = jnp.dot(h_f, whf, preferred_element_type=jnp.float32) + bhf
        gh_b = jnp.dot(h_b, whb, preferred_element_type=jnp.float32) + bhb

        hf_new = gru_cell(gi_f, gh_f, h_f)
        hb_new = gru_cell(gi_b, gh_b, h_b)

        # Packed-sequence masking: padded positions emit zeros, hidden state frozen.
        valid_f = k < lens                         # (Bblk, 1) bool
        valid_b = tb < lens
        hf_new = jnp.where(valid_f, hf_new, h_f)
        hb_new = jnp.where(valid_b, hb_new, h_b)

        out_ref[k, :, 0:H] = jnp.where(valid_f, hf_new, 0.0).astype(out_ref.dtype)
        out_ref[tb, :, H:2 * H] = jnp.where(valid_b, hb_new, 0.0).astype(out_ref.dtype)
        return hf_new, hb_new

    h0 = jnp.zeros((Bblk, H), jnp.float32)
    # Large unroll multiplies live gate temporaries against the 64-vreg file; 2 is a
    # safe default for long sequences, full unroll only for tiny T.
    unroll = True if T <= 16 else 2
    lax.fori_loop(0, T, body, (h0, h0), unroll=unroll)


# ----------------------------------------------------------------------------------
# Wrapper: VMEM-aware batch-block sizing + hoisted input projections.
# ----------------------------------------------------------------------------------
def _vmem_budget_bytes():
    """Physical VMEM capacity (falls back to the most conservative chip, v7x 64 MiB)."""
    try:
        return int(pltpu.get_tpu_info().vmem_capacity_bytes)
    except Exception:
        return 64 << 20


def _block_footprint_bytes(T, bblk, H):
    """Resident bytes for one batch block, including pipeline double-buffering."""
    gi_bytes = 2 * (T * bblk * 3 * H * 2)     # gi_f + gi_b, bf16
    out_bytes = T * bblk * 2 * H * 4          # merged output, f32
    return 2 * (gi_bytes + out_bytes)         # double-buffered by the pipeline


def _pick_batch_block(B, T, H, budget):
    """Largest batch block (multiple of 8 dividing B) whose resident footprint fits
    VMEM, preferring >= 2 blocks so both TensorCores get work (megacore)."""
    if B % 8 != 0:
        return B  # (8,128) rule: use the full (small / ragged) batch as one block.
    weight_bytes = 2 * (H * 3 * H * 4 + 3 * H * 4)
    headroom = 4 << 20
    candidates = []
    for cand in (512, 256, 128, 64, 32, 16, 8):
        if cand <= B and B % cand == 0:
            if _block_footprint_bytes(T, cand, H) + weight_bytes + headroom <= budget:
                candidates.append(cand)
    if not candidates:
        # VMEM-tight: fall back to the smallest legal block (next step would be
        # streaming gi in time chunks via manual DMA; not needed at these sizes).
        return 8
    multi = [c for c in candidates if B // c >= 2]
    return multi[0] if multi else candidates[0]


def fian_query_encoder(queries, querylen, params):
    """queries: [B, maxL, wordvec_dim] f32, querylen: [B] int -> [B, maxL, model_hidden_dim]."""
    B, T, D = queries.shape
    H = params["whf"].shape[0]

    xf = queries.astype(jnp.float32)
    wif = params["wif"].astype(jnp.float32)
    wib = params["wib"].astype(jnp.float32)
    bif = params["bif"].astype(jnp.float32)
    bib = params["bib"].astype(jnp.float32)

    # Hoisted input projections: one large MXU-shaped matmul per direction, produced
    # time-major so the recurrent kernel only indexes the cheap leading axis.  Stored
    # in bf16: precision is bounded by the recurrence anyway and this halves the HBM
    # traffic and VMEM footprint of the dominant tensor.
    gi_f = (jnp.einsum("btd,dg->tbg", xf, wif, preferred_element_type=jnp.float32)
            + bif).astype(jnp.bfloat16)                                   # (T, B, 3H)
    gi_b = (jnp.einsum("btd,dg->tbg", xf, wib, preferred_element_type=jnp.float32)
            + bib).astype(jnp.bfloat16)                                   # (T, B, 3H)

    lens2d = querylen.astype(jnp.int32).reshape(B, 1)
    whf = params["whf"].astype(jnp.float32)
    whb = params["whb"].astype(jnp.float32)
    bhf = params["bhf"].astype(jnp.float32)
    bhb = params["bhb"].astype(jnp.float32)

    budget = _vmem_budget_bytes()
    bblk = _pick_batch_block(B, T, H, budget)
    nb = B // bblk

    in_specs = [
        pl.BlockSpec((bblk, 1), lambda b: (b, 0)),                # lens
        pl.BlockSpec((T, bblk, 3 * H), lambda b: (0, b, 0)),      # fwd input gates
        pl.BlockSpec((T, bblk, 3 * H), lambda b: (0, b, 0)),      # bwd input gates
        pl.BlockSpec((H, 3 * H), lambda b: (0, 0)),               # W_hh fwd
        pl.BlockSpec((H, 3 * H), lambda b: (0, 0)),               # W_hh bwd
        pl.BlockSpec((1, 3 * H), lambda b: (0, 0)),               # b_hh fwd
        pl.BlockSpec((1, 3 * H), lambda b: (0, 0)),               # b_hh bwd
    ]
    out_specs = pl.BlockSpec((T, bblk, 2 * H), lambda b: (0, b, 0))

    weight_bytes = 2 * (H * 3 * H * 4 + 3 * H * 4) + bblk * 4
    footprint = _block_footprint_bytes(T, bblk, H) + weight_bytes
    vmem_limit = int(min(budget - (4 << 20), max(footprint + (4 << 20), 32 << 20)))
    vmem_limit = max(vmem_limit, 16 << 20)

    grid_spec = pltpu.PrefetchScalarGridSpec(
        num_scalar_prefetch=0,
        grid=(nb,),
        in_specs=in_specs,
        out_specs=out_specs,
    )

    out_tb = pl.pallas_call(
        _bigru_recurrence_kernel,
        out_shape=jax.ShapeDtypeStruct((T, B, 2 * H), jnp.float32),
        grid_spec=grid_spec,
        compiler_params=pltpu.CompilerParams(
            dimension_semantics=("parallel",),   # batch blocks are independent
            vmem_limit_bytes=vmem_limit),
    )(lens2d, gi_f, gi_b, whf, whb, bhf, bhb)

    # Back to batch-first [B, maxL, 2H] (= model_hidden_dim), matching batch_first=True.
    # (A downstream consumer could take the time-major layout directly and skip this.)
    return jnp.transpose(out_tb, (1, 0, 2))


# ----------------------------------------------------------------------------------
# Parameters + pure-JAX reference.
# ----------------------------------------------------------------------------------
def init_params(key, wordvec_dim, model_hidden_dim):
    """Deterministic synthetic GRU parameters (PyTorch-style uniform(-1/sqrt(H), 1/sqrt(H)))."""
    H = model_hidden_dim >> 1
    D = wordvec_dim
    scale = 1.0 / math.sqrt(H)
    keys = jax.random.split(key, 8)

    def u(k, shape):
        return jax.random.uniform(k, shape, jnp.float32, -scale, scale)

    return dict(
        wif=u(keys[0], (D, 3 * H)), whf=u(keys[1], (H, 3 * H)),
        bif=u(keys[2], (1, 3 * H)), bhf=u(keys[3], (1, 3 * H)),
        wib=u(keys[4], (D, 3 * H)), whb=u(keys[5], (H, 3 * H)),
        bib=u(keys[6], (1, 3 * H)), bhb=u(keys[7], (1, 3 * H)),
    )


def ref_bigru(queries, querylen, params):
    """Fully-f32 pure-JAX reference of the packed bidirectional GRU (torch.nn.GRU
    gate semantics: n = tanh(W_in x + b_in + r * (W_hn h + b_hn)))."""
    B, T, D = queries.shape
    H = params["whf"].shape[0]
    x = queries.astype(jnp.float32)
    lens = querylen.astype(jnp.int32)

    def cell(x_t, h, wi, wh, bi, bh):
        gi = jnp.dot(x_t, wi, preferred_element_type=jnp.float32) + bi
        gh = jnp.dot(h, wh, preferred_element_type=jnp.float32) + bh
        r = jax.nn.sigmoid(gi[:, :H] + gh[:, :H])
        z = jax.nn.sigmoid(gi[:, H:2 * H] + gh[:, H:2 * H])
        n = jnp.tanh(gi[:, 2 * H:] + r * gh[:, 2 * H:])
        return (1.0 - z) * n + z * h

    def fstep(h, t):
        h_new = cell(x[:, t], h, params["wif"].astype(jnp.float32),
                     params["whf"].astype(jnp.float32),
                     params["bif"].astype(jnp.float32),
                     params["bhf"].astype(jnp.float32))
        valid = (t < lens)[:, None]
        h_new = jnp.where(valid, h_new, h)
        return h_new, jnp.where(valid, h_new, 0.0)

    _, outs_f = lax.scan(fstep, jnp.zeros((B, H), jnp.float32), jnp.arange(T))
    outs_f = jnp.transpose(outs_f, (1, 0, 2))

    def bstep(h, t):
        h_new = cell(x[:, t], h, params["wib"].astype(jnp.float32),
                     params["whb"].astype(jnp.float32),
                     params["bib"].astype(jnp.float32),
                     params["bhb"].astype(jnp.float32))
        valid = (t < lens)[:, None]
        h_new = jnp.where(valid, h_new, h)
        return h_new, jnp.where(valid, h_new, 0.0)

    _, outs_b_rev = lax.scan(bstep, jnp.zeros((B, H), jnp.float32),
                             jnp.arange(T - 1, -1, -1))
    outs_b = jnp.transpose(outs_b_rev[::-1], (1, 0, 2))
    return jnp.concatenate([outs_f, outs_b], axis=-1)


if __name__ == "__main__":
    B, T = 2, 8
    wordvec_dim, model_hidden_dim = 32, 32

    key = jax.random.PRNGKey(0)
    k_x, k_p = jax.random.split(key)
    queries = jax.random.normal(k_x, (B, T, wordvec_dim), jnp.float32)
    querylen = jnp.array([8, 5], jnp.int32)
    params = init_params(k_p, wordvec_dim, model_hidden_dim)

    out = jax.jit(fian_query_encoder)(queries, querylen, params)
    out = jax.block_until_ready(out)

    assert out.shape == (B, T, model_hidden_dim), out.shape
    ref = ref_bigru(queries, querylen, params)
    # Tolerance accounts for the bf16 storage of the precomputed input gates.
    if not jnp.allclose(out, ref, atol=2e-2, rtol=2e-2):
        raise SystemExit("mismatch vs reference: max abs diff %e"
                         % float(jnp.max(jnp.abs(out - ref))))
    print("KERNEL_OK")
</pallas_src>

<mosaic_0001>
module attributes {stable_mosaic.version = 11 : i64} {
  func.func @_bigru_recurrence_kernel(%arg0: i32, %arg1: memref<2x1xi32, #tpu.memory_space<vmem>>, %arg2: memref<8x2x48xbf16, #tpu.memory_space<vmem>>, %arg3: memref<8x2x48xbf16, #tpu.memory_space<vmem>>, %arg4: memref<16x48xf32, #tpu.memory_space<vmem>>, %arg5: memref<16x48xf32, #tpu.memory_space<vmem>>, %arg6: memref<1x48xf32, #tpu.memory_space<vmem>>, %arg7: memref<1x48xf32, #tpu.memory_space<vmem>>, %arg8: memref<8x2x32xf32, #tpu.memory_space<vmem>>) attributes {dimension_semantics = [#tpu.dimension_semantics<parallel>], iteration_bounds = array<i64: 1>, scalar_prefetch = 0 : i64, scratch_operands = 0 : i64, tpu.core_type = #tpu.core_type<tc>, window_params = [{transform_indices = @transform_0, window_bounds = array<i64: 2, 1>}, {transform_indices = @transform_1, window_bounds = array<i64: 8, 2, 48>}, {transform_indices = @transform_2, window_bounds = array<i64: 8, 2, 48>}, {pipeline_mode = #tpu.pipeline_mode<synchronous>, transform_indices = @transform_3, window_bounds = array<i64: 16, 48>}, {pipeline_mode = #tpu.pipeline_mode<synchronous>, transform_indices = @transform_4, window_bounds = array<i64: 16, 48>}, {pipeline_mode = #tpu.pipeline_mode<synchronous>, transform_indices = @transform_5, window_bounds = array<i64: 1, 48>}, {pipeline_mode = #tpu.pipeline_mode<synchronous>, transform_indices = @transform_6, window_bounds = array<i64: 1, 48>}, {transform_indices = @transform_7, window_bounds = array<i64: 8, 2, 32>}]} {
    %c0 = arith.constant 0 : index
    %c0_0 = arith.constant 0 : index
    %0 = vector.load %arg1[%c0, %c0_0] : memref<2x1xi32, #tpu.memory_space<vmem>>, vector<2x1xi32>
    %c0_1 = arith.constant 0 : index
    %c0_2 = arith.constant 0 : index
    %1 = vector.load %arg4[%c0_1, %c0_2] : memref<16x48xf32, #tpu.memory_space<vmem>>, vector<16x48xf32>
    %c0_3 = arith.constant 0 : index
    %c0_4 = arith.constant 0 : index
    %2 = vector.load %arg5[%c0_3, %c0_4] : memref<16x48xf32, #tpu.memory_space<vmem>>, vector<16x48xf32>
    %c0_5 = arith.constant 0 : index
    %c0_6 = arith.constant 0 : index
    %3 = vector.load %arg6[%c0_5, %c0_6] : memref<1x48xf32, #tpu.memory_space<vmem>>, vector<1x48xf32>
    %c0_7 = arith.constant 0 : index
    %c0_8 = arith.constant 0 : index
    %4 = vector.load %arg7[%c0_7, %c0_8] : memref<1x48xf32, #tpu.memory_space<vmem>>, vector<1x48xf32>
    %cst = arith.constant 0.000000e+00 : f32
    %5 = vector.broadcast %cst : f32 to vector<2x16xf32>
    %c0_i32 = arith.constant 0 : i32
    %c7_i32 = arith.constant 7 : i32
    %6 = arith.subi %c7_i32, %c0_i32 : i32
    %7 = arith.index_cast %c0_i32 : i32 to index
    %c0_9 = arith.constant 0 : index
    %c0_10 = arith.constant 0 : index
    %8 = vector.load %arg2[%7, %c0_9, %c0_10] : memref<8x2x48xbf16, #tpu.memory_space<vmem>>, vector<1x2x48xbf16>
    %9 = vector.shape_cast %8 : vector<1x2x48xbf16> to vector<2x48xbf16>
    %10 = arith.extf %9 : vector<2x48xbf16> to vector<2x48xf32>
    %11 = arith.index_cast %6 : i32 to index
    %c0_11 = arith.constant 0 : index
    %c0_12 = arith.constant 0 : index
    %12 = vector.load %arg3[%11, %c0_11, %c0_12] : memref<8x2x48xbf16, #tpu.memory_space<vmem>>, vector<1x2x48xbf16>
    %13 = vector.shape_cast %12 : vector<1x2x48xbf16> to vector<2x48xbf16>
    %14 = arith.extf %13 : vector<2x48xbf16> to vector<2x48xf32>
    %cst_13 = arith.constant dense<0.000000e+00> : vector<2x48xf32>
    %15 = tpu.matmul %5, %1, %cst_13 {dimension_numbers = #tpu.dot_dimension_numbers<[1], [0], [0], [1], [0, 0, 1, 1], [], []>} : vector<2x16xf32>, vector<16x48xf32>, vector<2x48xf32> -> vector<2x48xf32>
    %16 = vector.broadcast %3 : vector<1x48xf32> to vector<2x48xf32>
    %17 = arith.addf %15, %16 : vector<2x48xf32>
    %cst_14 = arith.constant dense<0.000000e+00> : vector<2x48xf32>
    %18 = tpu.matmul %5, %2, %cst_14 {dimension_numbers = #tpu.dot_dimension_numbers<[1], [0], [0], [1], [0, 0, 1, 1], [], []>} : vector<2x16xf32>, vector<16x48xf32>, vector<2x48xf32> -> vector<2x48xf32>
    %19 = vector.broadcast %4 : vector<1x48xf32> to vector<2x48xf32>
    %20 = arith.addf %18, %19 : vector<2x48xf32>
    %21 = vector.extract_strided_slice %10 {offsets = [0, 0], sizes = [2, 16], strides = [1, 1]} : vector<2x48xf32> to vector<2x16xf32>
    %22 = vector.extract_strided_slice %17 {offsets = [0, 0], sizes = [2, 16], strides = [1, 1]} : vector<2x48xf32> to vector<2x16xf32>
    %23 = arith.addf %21, %22 : vector<2x16xf32>
    %24 = arith.negf %23 : vector<2x16xf32>
    %25 = math.exp %24 : vector<2x16xf32>
    %cst_15 = arith.constant 1.000000e+00 : f32
    %26 = vector.broadcast %cst_15 : f32 to vector<2x16xf32>
    %27 = arith.addf %26, %25 : vector<2x16xf32>
    %28 = arith.divf %26, %27 : vector<2x16xf32>
    %29 = vector.extract_strided_slice %10 {offsets = [0, 16], sizes = [2, 16], strides = [1, 1]} : vector<2x48xf32> to vector<2x16xf32>
    %30 = vector.extract_strided_slice %17 {offsets = [0, 16], sizes = [2, 16], strides = [1, 1]} : vector<2x48xf32> to vector<2x16xf32>
    %31 = arith.addf %29, %30 : vector<2x16xf32>
    %32 = arith.negf %31 : vector<2x16xf32>
    %33 = math.exp %32 : vector<2x16xf32>
    %cst_16 = arith.constant 1.000000e+00 : f32
    %34 = vector.broadcast %cst_16 : f32 to vector<2x16xf32>
    %35 = arith.addf %34, %33 : vector<2x16xf32>
    %36 = arith.divf %34, %35 : vector<2x16xf32>
    %37 = vector.extract_strided_slice %10 {offsets = [0, 32], sizes = [2, 16], strides = [1, 1]} : vector<2x48xf32> to vector<2x16xf32>
    %38 = vector.extract_strided_slice %17 {offsets = [0, 32], sizes = [2, 16], strides = [1, 1]} : vector<2x48xf32> to vector<2x16xf32>
    %39 = arith.mulf %28, %38 : vector<2x16xf32>
    %40 = arith.addf %37, %39 : vector<2x16xf32>
    %41 = math.tanh %40 : vector<2x16xf32>
    %cst_17 = arith.constant 1.000000e+00 : f32
    %42 = vector.broadcast %cst_17 : f32 to vector<2x16xf32>
    %43 = arith.subf %42, %36 : vector<2x16xf32>
    %44 = arith.mulf %43, %41 : vector<2x16xf32>
    %45 = arith.mulf %36, %5 : vector<2x16xf32>
    %46 = arith.addf %44, %45 : vector<2x16xf32>
    %47 = vector.extract_strided_slice %14 {offsets = [0, 0], sizes = [2, 16], strides = [1, 1]} : vector<2x48xf32> to vector<2x16xf32>
    %48 = vector.extract_strided_slice %20 {offsets = [0, 0], sizes = [2, 16], strides = [1, 1]} : vector<2x48xf32> to vector<2x16xf32>
    %49 = arith.addf %47, %48 : vector<2x16xf32>
    %50 = arith.negf %49 : vector<2x16xf32>
    %51 = math.exp %50 : vector<2x16xf32>
    %cst_18 = arith.constant 1.000000e+00 : f32
    %52 = vector.broadcast %cst_18 : f32 to vector<2x16xf32>
    %53 = arith.addf %52, %51 : vector<2x16xf32>
    %54 = arith.divf %52, %53 : vector<2x16xf32>
    %55 = vector.extract_strided_slice %14 {offsets = [0, 16], sizes = [2, 16], strides = [1, 1]} : vector<2x48xf32> to vector<2x16xf32>
    %56 = vector.extract_strided_slice %20 {offsets = [0, 16], sizes = [2, 16], strides = [1, 1]} : vector<2x48xf32> to vector<2x16xf32>
    %57 = arith.addf %55, %56 : vector<2x16xf32>
    %58 = arith.negf %57 : vector<2x16xf32>
    %59 = math.exp %58 : vector<2x16xf32>
    %cst_19 = arith.constant 1.000000e+00 : f32
    %60 = vector.broadcast %cst_19 : f32 to vector<2x16xf32>
    %61 = arith.addf %60, %59 : vector<2x16xf32>
    %62 = arith.divf %60, %61 : vector<2x16xf32>
    %63 = vector.extract_strided_slice %14 {offsets = [0, 32], sizes = [2, 16], strides = [1, 1]} : vector<2x48xf32> to vector<2x16xf32>
    %64 = vector.extract_strided_slice %20 {offsets = [0, 32], sizes = [2, 16], strides = [1, 1]} : vector<2x48xf32> to vector<2x16xf32>
    %65 = arith.mulf %54, %64 : vector<2x16xf32>
    %66 = arith.addf %63, %65 : vector<2x16xf32>
    %67 = math.tanh %66 : vector<2x16xf32>
    %cst_20 = arith.constant 1.000000e+00 : f32
    %68 = vector.broadcast %cst_20 : f32 to vector<2x16xf32>
    %69 = arith.subf %68, %62 : vector<2x16xf32>
    %70 = arith.mulf %69, %67 : vector<2x16xf32>
    %71 = arith.mulf %62, %5 : vector<2x16xf32>
    %72 = arith.addf %70, %71 : vector<2x16xf32>
    %73 = vector.broadcast %c0_i32 : i32 to vector<2x1xi32>
    %74 = arith.cmpi slt, %73, %0 : vector<2x1xi32>
    %75 = vector.broadcast %6 : i32 to vector<2x1xi32>
    %76 = arith.cmpi slt, %75, %0 : vector<2x1xi32>
    %77 = vector.shape_cast %74 : vector<2x1xi1> to vector<2x1xi1>
    %78 = vector.broadcast %77 : vector<2x1xi1> to vector<2x16xi1>
    %79 = arith.select %78, %46, %5 : vector<2x16xi1>, vector<2x16xf32>
    %80 = vector.shape_cast %76 : vector<2x1xi1> to vector<2x1xi1>
    %81 = vector.broadcast %80 : vector<2x1xi1> to vector<2x16xi1>
    %82 = arith.select %81, %72, %5 : vector<2x16xi1>, vector<2x16xf32>
    %cst_21 = arith.constant 0.000000e+00 : f32
    %83 = vector.shape_cast %74 : vector<2x1xi1> to vector<2x1xi1>
    %84 = vector.broadcast %83 : vector<2x1xi1> to vector<2x16xi1>
    %85 = vector.broadcast %cst_21 : f32 to vector<2x16xf32>
    %86 = arith.select %84, %79, %85 : vector<2x16xi1>, vector<2x16xf32>
    %87 = arith.index_cast %c0_i32 : i32 to index
    %c0_22 = arith.constant 0 : index
    %c0_23 = arith.constant 0 : index
    %88 = vector.load %arg8[%87, %c0_22, %c0_23] : memref<8x2x32xf32, #tpu.memory_space<vmem>>, vector<1x2x16xf32>
    %89 = vector.shape_cast %88 : vector<1x2x16xf32> to vector<2x16xf32>
    %90 = vector.shape_cast %86 : vector<2x16xf32> to vector<1x2x16xf32>
    tpu.vector_store %arg8[%87, %c0_22, %c0_23], %90 {strides = array<i32>} : memref<8x2x32xf32, #tpu.memory_space<vmem>>, vector<1x2x16xf32>,
    %cst_24 = arith.constant 0.000000e+00 : f32
    %91 = vector.shape_cast %76 : vector<2x1xi1> to vector<2x1xi1>
    %92 = vector.broadcast %91 : vector<2x1xi1> to vector<2x16xi1>
    %93 = vector.broadcast %cst_24 : f32 to vector<2x16xf32>
    %94 = arith.select %92, %82, %93 : vector<2x16xi1>, vector<2x16xf32>
    %95 = arith.index_cast %6 : i32 to index
    %c0_25 = arith.constant 0 : index
    %c16 = arith.constant 16 : index
    %96 = vector.load %arg8[%95, %c0_25, %c16] : memref<8x2x32xf32, #tpu.memory_space<vmem>>, vector<1x2x16xf32>
    %97 = vector.shape_cast %96 : vector<1x2x16xf32> to vector<2x16xf32>
    %98 = vector.shape_cast %94 : vector<2x16xf32> to vector<1x2x16xf32>
    tpu.vector_store %arg8[%95, %c0_25, %c16], %98 {strides = array<i32>} : memref<8x2x32xf32, #tpu.memory_space<vmem>>, vector<1x2x16xf32>,
    %c1_i32 = arith.constant 1 : i32
    %c7_i32_26 = arith.constant 7 : i32
    %99 = arith.subi %c7_i32_26, %c1_i32 : i32
    %100 = arith.index_cast %c1_i32 : i32 to index
    %c0_27 = arith.constant 0 : index
    %c0_28 = arith.constant 0 : index
    %101 = vector.load %arg2[%100, %c0_27, %c0_28] : memref<8x2x48xbf16, #tpu.memory_space<vmem>>, vector<1x2x48xbf16>
    %102 = vector.shape_cast %101 : vector<1x2x48xbf16> to vector<2x48xbf16>
    %103 = arith.extf %102 : vector<2x48xbf16> to vector<2x48xf32>
    %104 = arith.index_cast %99 : i32 to index
    %c0_29 = arith.constant 0 : index
    %c0_30 = arith.constant 0 : index
    %105 = vector.load %arg3[%104, %c0_29, %c0_30] : memref<8x2x48xbf16, #tpu.memory_space<vmem>>, vector<1x2x48xbf16>
    %106 = vector.shape_cast %105 : vector<1x2x48xbf16> to vector<2x48xbf16>
    %107 = arith.extf %106 : vector<2x48xbf16> to vector<2x48xf32>
    %cst_31 = arith.constant dense<0.000000e+00> : vector<2x48xf32>
    %108 = tpu.matmul %79, %1, %cst_31 {dimension_numbers = #tpu.dot_dimension_numbers<[1], [0], [0], [1], [0, 0, 1, 1], [], []>} : vector<2x16xf32>, vector<16x48xf32>, vector<2x48xf32> -> vector<2x48xf32>
    %109 = vector.broadcast %3 : vector<1x48xf32> to vector<2x48xf32>
    %110 = arith.addf %108, %109 : vector<2x48xf32>
    %cst_32 = arith.constant dense<0.000000e+00> : vector<2x48xf32>
    %111 = tpu.matmul %82, %2, %cst_32 {dimension_numbers = #tpu.dot_dimension_numbers<[1], [0], [0], [1], [0, 0, 1, 1], [], []>} : vector<2x16xf32>, vector<16x48xf32>, vector<2x48xf32> -> vector<2x48xf32>
    %112 = vector.broadcast %4 : vector<1x48xf32> to vector<2x48xf32>
    %113 = arith.addf %111, %112 : vector<2x48xf32>
    %114 = vector.extract_strided_slice %103 {offsets = [0, 0], sizes = [2, 16], strides = [1, 1]} : vector<2x48xf32> to vector<2x16xf32>
    %115 = vector.extract_strided_slice %110 {offsets = [0, 0], sizes = [2, 16], strides = [1, 1]} : vector<2x48xf32> to vector<2x16xf32>
    %116 = arith.addf %114, %115 : vector<2x16xf32>
    %117 = arith.negf %116 : vector<2x16xf32>
    %118 = math.exp %117 : vector<2x16xf32>
    %cst_33 = arith.constant 1.000000e+00 : f32
    %119 = vector.broadcast %cst_33 : f32 to vector<2x16xf32>
    %120 = arith.addf %119, %118 : vector<2x16xf32>
    %121 = arith.divf %119, %120 : vector<2x16xf32>
    %122 = vector.extract_strided_slice %103 {offsets = [0, 16], sizes = [2, 16], strides = [1, 1]} : vector<2x48xf32> to vector<2x16xf32>
    %123 = vector.extract_strided_slice %110 {offsets = [0, 16], sizes = [2, 16], strides = [1, 1]} : vector<2x48xf32> to vector<2x16xf32>
    %124 = arith.addf %122, %123 : vector<2x16xf32>
    %125 = arith.negf %124 : vector<2x16xf32>
    %126 = math.exp %125 : vector<2x16xf32>
    %cst_34 = arith.constant 1.000000e+00 : f32
    %127 = vector.broadcast %cst_34 : f32 to vector<2x16xf32>
    %128 = arith.addf %127, %126 : vector<2x16xf32>
    %129 = arith.divf %127, %128 : vector<2x16xf32>
    %130 = vector.extract_strided_slice %103 {offsets = [0, 32], sizes = [2, 16], strides = [1, 1]} : vector<2x48xf32> to vector<2x16xf32>
    %131 = vector.extract_strided_slice %110 {offsets = [0, 32], sizes = [2, 16], strides = [1, 1]} : vector<2x48xf32> to vector<2x16xf32>
    %132 = arith.mulf %121, %131 : vector<2x16xf32>
    %133 = arith.addf %130, %132 : vector<2x16xf32>
    %134 = math.tanh %133 : vector<2x16xf32>
    %cst_35 = arith.constant 1.000000e+00 : f32
    %135 = vector.broadcast %cst_35 : f32 to vector<2x16xf32>
    %136 = arith.subf %135, %129 : vector<2x16xf32>
    %137 = arith.mulf %136, %134 : vector<2x16xf32>
    %138 = arith.mulf %129, %79 : vector<2x16xf32>
    %139 = arith.addf %137, %138 : vector<2x16xf32>
    %140 = vector.extract_strided_slice %107 {offsets = [0, 0], sizes = [2, 16], strides = [1, 1]} : vector<2x48xf32> to vector<2x16xf32>
    %141 = vector.extract_strided_slice %113 {offsets = [0, 0], sizes = [2, 16], strides = [1, 1]} : vector<2x48xf32> to vector<2x16xf32>
    %142 = arith.addf %140, %141 : vector<2x16xf32>
    %143 = arith.negf %142 : vector<2x16xf32>
    %144 = math.exp %143 : vector<2x16xf32>
    %cst_36 = arith.constant 1.000000e+00 : f32
    %145 = vector.broadcast %cst_36 : f32 to vector<2x16xf32>
    %146 = arith.addf %145, %144 : vector<2x16xf32>
    %147 = arith.divf %145, %146 : vector<2x16xf32>
    %148 = vector.extract_strided_slice %107 {offsets = [0, 16], sizes = [2, 16], strides = [1, 1]} : vector<2x48xf32> to vector<2x16xf32>
    %149 = vector.extract_strided_slice %113 {offsets = [0, 16], sizes = [2, 16], strides = [1, 1]} : vector<2x48xf32> to vector<2x16xf32>
    %150 = arith.addf %148, %149 : vector<2x16xf32>
    %151 = arith.negf %150 : vector<2x16xf32>
    %152 = math.exp %151 : vector<2x16xf32>
    %cst_37 = arith.constant 1.000000e+00 : f32
    %153 = vector.broadcast %cst_37 : f32 to vector<2x16xf32>
    %154 = arith.addf %153, %152 : vector<2x16xf32>
    %155 = arith.divf %153, %154 : vector<2x16xf32>
    %156 = vector.extract_strided_slice %107 {offsets = [0, 32], sizes = [2, 16], strides = [1, 1]} : vector<2x48xf32> to vector<2x16xf32>
    %157 = vector.extract_strided_slice %113 {offsets = [0, 32], sizes = [2, 16], strides = [1, 1]} : vector<2x48xf32> to vector<2x16xf32>
    %158 = arith.mulf %147, %157 : vector<2x16xf32>
    %159 = arith.addf %156, %158 : vector<2x16xf32>
    %160 = math.tanh %159 : vector<2x16xf32>
    %cst_38 = arith.constant 1.000000e+00 : f32
    %161 = vector.broadcast %cst_38 : f32 to vector<2x16xf32>
    %162 = arith.subf %161, %155 : vector<2x16xf32>
    %163 = arith.mulf %162, %160 : vector<2x16xf32>
    %164 = arith.mulf %155, %82 : vector<2x16xf32>
    %165 = arith.addf %163, %164 : vector<2x16xf32>
    %166 = vector.broadcast %c1_i32 : i32 to vector<2x1xi32>
    %167 = arith.cmpi slt, %166, %0 : vector<2x1xi32>
    %168 = vector.broadcast %99 : i32 to vector<2x1xi32>
    %169 = arith.cmpi slt, %168, %0 : vector<2x1xi32>
    %170 = vector.shape_cast %167 : vector<2x1xi1> to vector<2x1xi1>
    %171 = vector.broadcast %170 : vector<2x1xi1> to vector<2x16xi1>
    %172 = arith.select %171, %139, %79 : vector<2x16xi1>, vector<2x16xf32>
    %173 = vector.shape_cast %169 : vector<2x1xi1> to vector<2x1xi1>
    %174 = vector.broadcast %173 : vector<2x1xi1> to vector<2x16xi1>
    %175 = arith.select %174, %165, %82 : vector<2x16xi1>, vector<2x16xf32>
    %cst_39 = arith.constant 0.000000e+00 : f32
    %176 = vector.shape_cast %167 : vector<2x1xi1> to vector<2x1xi1>
    %177 = vector.broadcast %176 : vector<2x1xi1> to vector<2x16xi1>
    %178 = vector.broadcast %cst_39 : f32 to vector<2x16xf32>
    %179 = arith.select %177, %172, %178 : vector<2x16xi1>, vector<2x16xf32>
    %180 = arith.index_cast %c1_i32 : i32 to index
    %c0_40 = arith.constant 0 : index
    %c0_41 = arith.constant 0 : index
    %181 = vector.load %arg8[%180, %c0_40, %c0_41] : memref<8x2x32xf32, #tpu.memory_space<vmem>>, vector<1x2x16xf32>
    %182 = vector.shape_cast %181 : vector<1x2x16xf32> to vector<2x16xf32>
    %183 = vector.shape_cast %179 : vector<2x16xf32> to vector<1x2x16xf32>
    tpu.vector_store %arg8[%180, %c0_40, %c0_41], %183 {strides = array<i32>} : memref<8x2x32xf32, #tpu.memory_space<vmem>>, vector<1x2x16xf32>,
    %cst_42 = arith.constant 0.000000e+00 : f32
    %184 = vector.shape_cast %169 : vector<2x1xi1> to vector<2x1xi1>
    %185 = vector.broadcast %184 : vector<2x1xi1> to vector<2x16xi1>
    %186 = vector.broadcast %cst_42 : f32 to vector<2x16xf32>
    %187 = arith.select %185, %175, %186 : vector<2x16xi1>, vector<2x16xf32>
    %188 = arith.index_cast %99 : i32 to index
    %c0_43 = arith.constant 0 : index
    %c16_44 = arith.constant 16 : index
    %189 = vector.load %arg8[%188, %c0_43, %c16_44] : memref<8x2x32xf32, #tpu.memory_space<vmem>>, vector<1x2x16xf32>
    %190 = vector.shape_cast %189 : vector<1x2x16xf32> to vector<2x16xf32>
    %191 = vector.shape_cast %187 : vector<2x16xf32> to vector<1x2x16xf32>
    tpu.vector_store %arg8[%188, %c0_43, %c16_44], %191 {strides = array<i32>} : memref<8x2x32xf32, #tpu.memory_space<vmem>>, vector<1x2x16xf32>,
    %c2_i32 = arith.constant 2 : i32
    %c7_i32_45 = arith.constant 7 : i32
    %192 = arith.subi %c7_i32_45, %c2_i32 : i32
    %193 = arith.index_cast %c2_i32 : i32 to index
    %c0_46 = arith.constant 0 : index
    %c0_47 = arith.constant 0 : index
    %194 = vector.load %arg2[%193, %c0_46, %c0_47] : memref<8x2x48xbf16, #tpu.memory_space<vmem>>, vector<1x2x48xbf16>
    %195 = vector.shape_cast %194 : vector<1x2x48xbf16> to vector<2x48xbf16>
    %196 = arith.extf %195 : vector<2x48xbf16> to vector<2x48xf32>
    %197 = arith.index_cast %192 : i32 to index
    %c0_48 = arith.constant 0 : index
    %c0_49 = arith.constant 0 : index
    %198 = vector.load %arg3[%197, %c0_48, %c0_49] : memref<8x2x48xbf16, #tpu.memory_space<vmem>>, vector<1x2x48xbf16>
    %199 = vector.shape_cast %198 : vector<1x2x48xbf16> to vector<2x48xbf16>
    %200 = arith.extf %199 : vector<2x48xbf16> to vector<2x48xf32>
    %cst_50 = arith.constant dense<0.000000e+00> : vector<2x48xf32>
    %201 = tpu.matmul %172, %1, %cst_50 {dimension_numbers = #tpu.dot_dimension_numbers<[1], [0], [0], [1], [0, 0, 1, 1], [], []>} : vector<2x16xf32>, vector<16x48xf32>, vector<2x48xf32> -> vector<2x48xf32>
    %202 = vector.broadcast %3 : vector<1x48xf32> to vector<2x48xf32>
    %203 = arith.addf %201, %202 : vector<2x48xf32>
    %cst_51 = arith.constant dense<0.000000e+00> : vector<2x48xf32>
    %204 = tpu.matmul %175, %2, %cst_51 {dimension_numbers = #tpu.dot_dimension_numbers<[1], [0], [0], [1], [0, 0, 1, 1], [], []>} : vector<2x16xf32>, vector<16x48xf32>, vector<2x48xf32> -> vector<2x48xf32>
    %205 = vector.broadcast %4 : vector<1x48xf32> to vector<2x48xf32>
    %206 = arith.addf %204, %205 : vector<2x48xf32>
    %207 = vector.extract_strided_slice %196 {offsets = [0, 0], sizes = [2, 16], strides = [1, 1]} : vector<2x48xf32> to vector<2x16xf32>
    %208 = vector.extract_strided_slice %203 {offsets = [0, 0], sizes = [2, 16], strides = [1, 1]} : vector<2x48xf32> to vector<2x16xf32>
    %209 = arith.addf %207, %208 : vector<2x16xf32>
    %210 = arith.negf %209 : vector<2x16xf32>
    %211 = math.exp %210 : vector<2x16xf32>
    %cst_52 = arith.constant 1.000000e+00 : f32
    %212 = vector.broadcast %cst_52 : f32 to vector<2x16xf32>
    %213 = arith.addf %212, %211 : vector<2x16xf32>
    %214 = arith.divf %212, %213 : vector<2x16xf32>
    %215 = vector.extract_strided_slice %196 {offsets = [0, 16], sizes = [2, 16], strides = [1, 1]} : vector<2x48xf32> to vector<2x16xf32>
    %216 = vector.extract_strided_slice %203 {offsets = [0, 16], sizes = [2, 16], strides = [1, 1]} : vector<2x48xf32> to vector<2x16xf32>
    %217 = arith.addf %215, %216 : vector<2x16xf32>
    %218 = arith.negf %217 : vector<2x16xf32>
    %219 = math.exp %218 : vector<2x16xf32>
    %cst_53 = arith.constant 1.000000e+00 : f32
    %220 = vector.broadcast %cst_53 : f32 to vector<2x16xf32>
    %221 = arith.addf %220, %219 : vector<2x16xf32>
    %222 = arith.divf %220, %221 : vector<2x16xf32>
    %223 = vector.extract_strided_slice %196 {offsets = [0, 32], sizes = [2, 16], strides = [1, 1]} : vector<2x48xf32> to vector<2x16xf32>
    %224 = vector.extract_strided_slice %203 {offsets = [0, 32], sizes = [2, 16], strides = [1, 1]} : vector<2x48xf32> to vector<2x16xf32>
    %225 = arith.mulf %214, %224 : vector<2x16xf32>
    %226 = arith.addf %223, %225 : vector<2x16xf32>
    %227 = math.tanh %226 : vector<2x16xf32>
    %cst_54 = arith.constant 1.000000e+00 : f32
    %228 = vector.broadcast %cst_54 : f32 to vector<2x16xf32>
    %229 = arith.subf %228, %222 : vector<2x16xf32>
    %230 = arith.mulf %229, %227 : vector<2x16xf32>
    %231 = arith.mulf %222, %172 : vector<2x16xf32>
    %232 = arith.addf %230, %231 : vector<2x16xf32>
    %233 = vector.extract_strided_slice %200 {offsets = [0, 0], sizes = [2, 16], strides = [1, 1]} : vector<2x48xf32> to vector<2x16xf32>
    %234 = vector.extract_strided_slice %206 {offsets = [0, 0], sizes = [2, 16], strides = [1, 1]} : vector<2x48xf32> to vector<2x16xf32>
    %235 = arith.addf %233, %234 : vector<2x16xf32>
    %236 = arith.negf %235 : vector<2x16xf32>
    %237 = math.exp %236 : vector<2x16xf32>
    %cst_55 = arith.constant 1.000000e+00 : f32
    %238 = vector.broadcast %cst_55 : f32 to vector<2x16xf32>
    %239 = arith.addf %238, %237 : vector<2x16xf32>
    %240 = arith.divf %238, %239 : vector<2x16xf32>
    %241 = vector.extract_strided_slice %200 {offsets = [0, 16], sizes = [2, 16], strides = [1, 1]} : vector<2x48xf32> to vector<2x16xf32>
    %242 = vector.extract_strided_slice %206 {offsets = [0, 16], sizes = [2, 16], strides = [1, 1]} : vector<2x48xf32> to vector<2x16xf32>
    %243 = arith.addf %241, %242 : vector<2x16xf32>
    %244 = arith.negf %243 : vector<2x16xf32>
    %245 = math.exp %244 : vector<2x16xf32>
    %cst_56 = arith.constant 1.000000e+00 : f32
    %246 = vector.broadcast %cst_56 : f32 to vector<2x16xf32>
    %247 = arith.addf %246, %245 : vector<2x16xf32>
    %248 = arith.divf %246, %247 : vector<2x16xf32>
    %249 = vector.extract_strided_slice %200 {offsets = [0, 32], sizes = [2, 16], strides = [1, 1]} : vector<2x48xf32> to vector<2x16xf32>
    %250 = vector.extract_strided_slice %206 {offsets = [0, 32], sizes = [2, 16], strides = [1, 1]} : vector<2x48xf32> to vector<2x16xf32>
    %251 = arith.mulf %240, %250 : vector<2x16xf32>
    %252 = arith.addf %249, %251 : vector<2x16xf32>
    %253 = math.tanh %252 : vector<2x16xf32>
    %cst_57 = arith.constant 1.000000e+00 : f32
    %254 = vector.broadcast %cst_57 : f32 to vector<2x16xf32>
    %255 = arith.subf %254, %248 : vector<2x16xf32>
    %256 = arith.mulf %255, %253 : vector<2x16xf32>
    %257 = arith.mulf %248, %175 : vector<2x16xf32>
    %258 = arith.addf %256, %257 : vector<2x16xf32>
    %259 = vector.broadcast %c2_i32 : i32 to vector<2x1xi32>
    %260 = arith.cmpi slt, %259, %0 : vector<2x1xi32>
    %261 = vector.broadcast %192 : i32 to vector<2x1xi32>
    %262 = arith.cmpi slt, %261, %0 : vector<2x1xi32>
    %263 = vector.shape_cast %260 : vector<2x1xi1> to vector<2x1xi1>
    %264 = vector.broadcast %263 : vector<2x1xi1> to vector<2x16xi1>
    %265 = arith.select %264, %232, %172 : vector<2x16xi1>, vector<2x16xf32>
    %266 = vector.shape_cast %262 : vector<2x1xi1> to vector<2x1xi1>
    %267 = vector.broadcast %266 : vector<2x1xi1> to vector<2x16xi1>
    %268 = arith.select %267, %258, %175 : vector<2x16xi1>, vector<2x16xf32>
    %cst_58 = arith.constant 0.000000e+00 : f32
    %269 = vector.shape_cast %260 : vector<2x1xi1> to vector<2x1xi1>
    %270 = vector.broadcast %269 : vector<2x1xi1> to vector<2x16xi1>
    %271 = vector.broadcast %cst_58 : f32 to vector<2x16xf32>
    %272 = arith.select %270, %265, %271 : vector<2x16xi1>, vector<2x16xf32>
    %273 = arith.index_cast %c2_i32 : i32 to index
    %c0_59 = arith.constant 0 : index
    %c0_60 = arith.constant 0 : index
    %274 = vector.load %arg8[%273, %c0_59, %c0_60] : memref<8x2x32xf32, #tpu.memory_space<vmem>>, vector<1x2x16xf32>
    %275 = vector.shape_cast %274 : vector<1x2x16xf32> to vector<2x16xf32>
    %276 = vector.shape_cast %272 : vector<2x16xf32> to vector<1x2x16xf32>
    tpu.vector_store %arg8[%273, %c0_59, %c0_60], %276 {strides = array<i32>} : memref<8x2x32xf32, #tpu.memory_space<vmem>>, vector<1x2x16xf32>,
    %cst_61 = arith.constant 0.000000e+00 : f32
    %277 = vector.shape_cast %262 : vector<2x1xi1> to vector<2x1xi1>
    %278 = vector.broadcast %277 : vector<2x1xi1> to vector<2x16xi1>
    %279 = vector.broadcast %cst_61 : f32 to vector<2x16xf32>
    %280 = arith.select %278, %268, %279 : vector<2x16xi1>, vector<2x16xf32>
    %281 = arith.index_cast %192 : i32 to index
    %c0_62 = arith.constant 0 : index
    %c16_63 = arith.constant 16 : index
    %282 = vector.load %arg8[%281, %c0_62, %c16_63] : memref<8x2x32xf32, #tpu.memory_space<vmem>>, vector<1x2x16xf32>
    %283 = vector.shape_cast %282 : vector<1x2x16xf32> to vector<2x16xf32>
    %284 = vector.shape_cast %280 : vector<2x16xf32> to vector<1x2x16xf32>
    tpu.vector_store %arg8[%281, %c0_62, %c16_63], %284 {strides = array<i32>} : memref<8x2x32xf32, #tpu.memory_space<vmem>>, vector<1x2x16xf32>,
    %c3_i32 = arith.constant 3 : i32
    %c7_i32_64 = arith.constant 7 : i32
    %285 = arith.subi %c7_i32_64, %c3_i32 : i32
    %286 = arith.index_cast %c3_i32 : i32 to index
    %c0_65 = arith.constant 0 : index
    %c0_66 = arith.constant 0 : index
    %287 = vector.load %arg2[%286, %c0_65, %c0_66] : memref<8x2x48xbf16, #tpu.memory_space<vmem>>, vector<1x2x48xbf16>
    %288 = vector.shape_cast %287 : vector<1x2x48xbf16> to vector<2x48xbf16>
    %289 = arith.extf %288 : vector<2x48xbf16> to vector<2x48xf32>
    %290 = arith.index_cast %285 : i32 to index
    %c0_67 = arith.constant 0 : index
    %c0_68 = arith.constant 0 : index
    %291 = vector.load %arg3[%290, %c0_67, %c0_68] : memref<8x2x48xbf16, #tpu.memory_space<vmem>>, vector<1x2x48xbf16>
    %292 = vector.shape_cast %291 : vector<1x2x48xbf16> to vector<2x48xbf16>
    %293 = arith.extf %292 : vector<2x48xbf16> to vector<2x48xf32>
    %cst_69 = arith.constant dense<0.000000e+00> : vector<2x48xf32>
    %294 = tpu.matmul %265, %1, %cst_69 {dimension_numbers = #tpu.dot_dimension_numbers<[1], [0], [0], [1], [0, 0, 1, 1], [], []>} : vector<2x16xf32>, vector<16x48xf32>, vector<2x48xf32> -> vector<2x48xf32>
    %295 = vector.broadcast %3 : vector<1x48xf32> to vector<2x48xf32>
    %296 = arith.addf %294, %295 : vector<2x48xf32>
    %cst_70 = arith.constant dense<0.000000e+00> : vector<2x48xf32>
    %297 = tpu.matmul %268, %2, %cst_70 {dimension_numbers = #tpu.dot_dimension_numbers<[1], [0], [0], [1], [0, 0, 1, 1], [], []>} : vector<2x16xf32>, vector<16x48xf32>, vector<2x48xf32> -> vector<2x48xf32>
    %298 = vector.broadcast %4 : vector<1x48xf32> to vector<2x48xf32>
    %299 = arith.addf %297, %298 : vector<2x48xf32>
    %300 = vector.extract_strided_slice %289 {offsets = [0, 0], sizes = [2, 16], strides = [1, 1]} : vector<2x48xf32> to vector<2x16xf32>
    %301 = vector.extract_strided_slice %296 {offsets = [0, 0], sizes = [2, 16], strides = [1, 1]} : vector<2x48xf32> to vector<2x16xf32>
    %302 = arith.addf %300, %301 : vector<2x16xf32>
    %303 = arith.negf %302 : vector<2x16xf32>
    %304 = math.exp %303 : vector<2x16xf32>
    %cst_71 = arith.constant 1.000000e+00 : f32
    %305 = vector.broadcast %cst_71 : f32 to vector<2x16xf32>
    %306 = arith.addf %305, %304 : vector<2x16xf32>
    %307 = arith.divf %305, %306 : vector<2x16xf32>
    %308 = vector.extract_strided_slice %289 {offsets = [0, 16], sizes = [2, 16], strides = [1, 1]} : vector<2x48xf32> to vector<2x16xf32>
    %309 = vector.extract_strided_slice %296 {offsets = [0, 16], sizes = [2, 16], strides = [1, 1]} : vector<2x48xf32> to vector<2x16xf32>
    %310 = arith.addf %308, %309 : vector<2x16xf32>
    %311 = arith.negf %310 : vector<2x16xf32>
    %312 = math.exp %311 : vector<2x16xf32>
    %cst_72 = arith.constant 1.000000e+00 : f32
    %313 = vector.broadcast %cst_72 : f32 to vector<2x16xf32>
    %314 = arith.addf %313, %312 : vector<2x16xf32>
    %315 = arith.divf %313, %314 : vector<2x16xf32>
    %316 = vector.extract_strided_slice %289 {offsets = [0, 32], sizes = [2, 16], strides = [1, 1]} : vector<2x48xf32> to vector<2x16xf32>
    %317 = vector.extract_strided_slice %296 {offsets = [0, 32], sizes = [2, 16], strides = [1, 1]} : vector<2x48xf32> to vector<2x16xf32>
    %318 = arith.mulf %307, %317 : vector<2x16xf32>
    %319 = arith.addf %316, %318 : vector<2x16xf32>
    %320 = math.tanh %319 : vector<2x16xf32>
    %cst_73 = arith.constant 1.000000e+00 : f32
    %321 = vector.broadcast %cst_73 : f32 to vector<2x16xf32>
    %322 = arith.subf %321, %315 : vector<2x16xf32>
    %323 = arith.mulf %322, %320 : vector<2x16xf32>
    %324 = arith.mulf %315, %265 : vector<2x16xf32>
    %325 = arith.addf %323, %324 : vector<2x16xf32>
    %326 = vector.extract_strided_slice %293 {offsets = [0, 0], sizes = [2, 16], strides = [1, 1]} : vector<2x48xf32> to vector<2x16xf32>
    %327 = vector.extract_strided_slice %299 {offsets = [0, 0], sizes = [2, 16], strides = [1, 1]} : vector<2x48xf32> to vector<2x16xf32>
    %328 = arith.addf %326, %327 : vector<2x16xf32>
    %329 = arith.negf %328 : vector<2x16xf32>
    %330 = math.exp %329 : vector<2x16xf32>
    %cst_74 = arith.constant 1.000000e+00 : f32
    %331 = vector.broadcast %cst_74 : f32 to vector<2x16xf32>
    %332 = arith.addf %331, %330 : vector<2x16xf32>
    %333 = arith.divf %331, %332 : vector<2x16xf32>
    %334 = vector.extract_strided_slice %293 {offsets = [0, 16], sizes = [2, 16], strides = [1, 1]} : vector<2x48xf32> to vector<2x16xf32>
    %335 = vector.extract_strided_slice %299 {offsets = [0, 16], sizes = [2, 16], strides = [1, 1]} : vector<2x48xf32> to vector<2x16xf32>
    %336 = arith.addf %334, %335 : vector<2x16xf32>
    %337 = arith.negf %336 : vector<2x16xf32>
    %338 = math.exp %337 : vector<2x16xf32>
    %cst_75 = arith.constant 1.000000e+00 : f32
    %339 = vector.broadcast %cst_75 : f32 to vector<2x16xf32>
    %340 = arith.addf %339, %338 : vector<2x16xf32>
    %341 = arith.divf %339, %340 : vector<2x16xf32>
    %342 = vector.extract_strided_slice %293 {offsets = [0, 32], sizes = [2, 16], strides = [1, 1]} : vector<2x48xf32> to vector<2x16xf32>
    %343 = vector.extract_strided_slice %299 {offsets = [0, 32], sizes = [2, 16], strides = [1, 1]} : vector<2x48xf32> to vector<2x16xf32>
    %344 = arith.mulf %333, %343 : vector<2x16xf32>
    %345 = arith.addf %342, %344 : vector<2x16xf32>
    %346 = math.tanh %345 : vector<2x16xf32>
    %cst_76 = arith.constant 1.000000e+00 : f32
    %347 = vector.broadcast %cst_76 : f32 to vector<2x16xf32>
    %348 = arith.subf %347, %341 : vector<2x16xf32>
    %349 = arith.mulf %348, %346 : vector<2x16xf32>
    %350 = arith.mulf %341, %268 : vector<2x16xf32>
    %351 = arith.addf %349, %350 : vector<2x16xf32>
    %352 = vector.broadcast %c3_i32 : i32 to vector<2x1xi32>
    %353 = arith.cmpi slt, %352, %0 : vector<2x1xi32>
    %354 = vector.broadcast %285 : i32 to vector<2x1xi32>
    %355 = arith.cmpi slt, %354, %0 : vector<2x1xi32>
    %356 = vector.shape_cast %353 : vector<2x1xi1> to vector<2x1xi1>
    %357 = vector.broadcast %356 : vector<2x1xi1> to vector<2x16xi1>
    %358 = arith.select %357, %325, %265 : vector<2x16xi1>, vector<2x16xf32>
    %359 = vector.shape_cast %355 : vector<2x1xi1> to vector<2x1xi1>
    %360 = vector.broadcast %359 : vector<2x1xi1> to vector<2x16xi1>
    %361 = arith.select %360, %351, %268 : vector<2x16xi1>, vector<2x16xf32>
    %cst_77 = arith.constant 0.000000e+00 : f32
    %362 = vector.shape_cast %353 : vector<2x1xi1> to vector<2x1xi1>
    %363 = vector.broadcast %362 : vector<2x1xi1> to vector<2x16xi1>
    %364 = vector.broadcast %cst_77 : f32 to vector<2x16xf32>
    %365 = arith.select %363, %358, %364 : vector<2x16xi1>, vector<2x16xf32>
    %366 = arith.index_cast %c3_i32 : i32 to index
    %c0_78 = arith.constant 0 : index
    %c0_79 = arith.constant 0 : index
    %367 = vector.load %arg8[%366, %c0_78, %c0_79] : memref<8x2x32xf32, #tpu.memory_space<vmem>>, vector<1x2x16xf32>
    %368 = vector.shape_cast %367 : vector<1x2x16xf32> to vector<2x16xf32>
    %369 = vector.shape_cast %365 : vector<2x16xf32> to vector<1x2x16xf32>
    tpu.vector_store %arg8[%366, %c0_78, %c0_79], %369 {strides = array<i32>} : memref<8x2x32xf32, #tpu.memory_space<vmem>>, vector<1x2x16xf32>,
    %cst_80 = arith.constant 0.000000e+00 : f32
    %370 = vector.shape_cast %355 : vector<2x1xi1> to vector<2x1xi1>
    %371 = vector.broadcast %370 : vector<2x1xi1> to vector<2x16xi1>
    %372 = vector.broadcast %cst_80 : f32 to vector<2x16xf32>
    %373 = arith.select %371, %361, %372 : vector<2x16xi1>, vector<2x16xf32>
    %374 = arith.index_cast %285 : i32 to index
    %c0_81 = arith.constant 0 : index
    %c16_82 = arith.constant 16 : index
    %375 = vector.load %arg8[%374, %c0_81, %c16_82] : memref<8x2x32xf32, #tpu.memory_space<vmem>>, vector<1x2x16xf32>
    %376 = vector.shape_cast %375 : vector<1x2x16xf32> to vector<2x16xf32>
    %377 = vector.shape_cast %373 : vector<2x16xf32> to vector<1x2x16xf32>
    tpu.vector_store %arg8[%374, %c0_81, %c16_82], %377 {strides = array<i32>} : memref<8x2x32xf32, #tpu.memory_space<vmem>>, vector<1x2x16xf32>,
    %c4_i32 = arith.constant 4 : i32
    %c7_i32_83 = arith.constant 7 : i32
    %378 = arith.subi %c7_i32_83, %c4_i32 : i32
    %379 = arith.index_cast %c4_i32 : i32 to index
    %c0_84 = arith.constant 0 : index
    %c0_85 = arith.constant 0 : index
    %380 = vector.load %arg2[%379, %c0_84, %c0_85] : memref<8x2x48xbf16, #tpu.memory_space<vmem>>, vector<1x2x48xbf16>
    %381 = vector.shape_cast %380 : vector<1x2x48xbf16> to vector<2x48xbf16>
    %382 = arith.extf %381 : vector<2x48xbf16> to vector<2x48xf32>
    %383 = arith.index_cast %378 : i32 to index
    %c0_86 = arith.constant 0 : index
    %c0_87 = arith.constant 0 : index
    %384 = vector.load %arg3[%383, %c0_86, %c0_87] : memref<8x2x48xbf16, #tpu.memory_space<vmem>>, vector<1x2x48xbf16>
    %385 = vector.shape_cast %384 : vector<1x2x48xbf16> to vector<2x48xbf16>
    %386 = arith.extf %385 : vector<2x48xbf16> to vector<2x48xf32>
    %cst_88 = arith.constant dense<0.000000e+00> : vector<2x48xf32>
    %387 = tpu.matmul %358, %1, %cst_88 {dimension_numbers = #tpu.dot_dimension_numbers<[1], [0], [0], [1], [0, 0, 1, 1], [], []>} : vector<2x16xf32>, vector<16x48xf32>, vector<2x48xf32> -> vector<2x48xf32>
    %388 = vector.broadcast %3 : vector<1x48xf32> to vector<2x48xf32>
    %389 = arith.addf %387, %388 : vector<2x48xf32>
    %cst_89 = arith.constant dense<0.000000e+00> : vector<2x48xf32>
    %390 = tpu.matmul %361, %2, %cst_89 {dimension_numbers = #tpu.dot_dimension_numbers<[1], [0], [0], [1], [0, 0, 1, 1], [], []>} : vector<2x16xf32>, vector<16x48xf32>, vector<2x48xf32> -> vector<2x48xf32>
    %391 = vector.broadcast %4 : vector<1x48xf32> to vector<2x48xf32>
    %392 = arith.addf %390, %391 : vector<2x48xf32>
    %393 = vector.extract_strided_slice %382 {offsets = [0, 0], sizes = [2, 16], strides = [1, 1]} : vector<2x48xf32> to vector<2x16xf32>
    %394 = vector.extract_strided_slice %389 {offsets = [0, 0], sizes = [2, 16], strides = [1, 1]} : vector<2x48xf32> to vector<2x16xf32>
    %395 = arith.addf %393, %394 : vector<2x16xf32>
    %396 = arith.negf %395 : vector<2x16xf32>
    %397 = math.exp %396 : vector<2x16xf32>
    %cst_90 = arith.constant 1.000000e+00 : f32
    %398 = vector.broadcast %cst_90 : f32 to vector<2x16xf32>
    %399 = arith.addf %398, %397 : vector<2x16xf32>
    %400 = arith.divf %398, %399 : vector<2x16xf32>
    %401 = vector.extract_strided_slice %382 {offsets = [0, 16], sizes = [2, 16], strides = [1, 1]} : vector<2x48xf32> to vector<2x16xf32>
    %402 = vector.extract_strided_slice %389 {offsets = [0, 16], sizes = [2, 16], strides = [1, 1]} : vector<2x48xf32> to vector<2x16xf32>
    %403 = arith.addf %401, %402 : vector<2x16xf32>
    %404 = arith.negf %403 : vector<2x16xf32>
    %405 = math.exp %404 : vector<2x16xf32>
    %cst_91 = arith.constant 1.000000e+00 : f32
    %406 = vector.broadcast %cst_91 : f32 to vector<2x16xf32>
    %407 = arith.addf %406, %405 : vector<2x16xf32>
    %408 = arith.divf %406, %407 : vector<2x16xf32>
    %409 = vector.extract_strided_slice %382 {offsets = [0, 32], sizes = [2, 16], strides = [1, 1]} : vector<2x48xf32> to vector<2x16xf32>
    %410 = vector.extract_strided_slice %389 {offsets = [0, 32], sizes = [2, 16], strides = [1, 1]} : vector<2x48xf32> to vector<2x16xf32>
    %411 = arith.mulf %400, %410 : vector<2x16xf32>
    %412 = arith.addf %409, %411 : vector<2x16xf32>
    %413 = math.tanh %412 : vector<2x16xf32>
    %cst_92 = arith.constant 1.000000e+00 : f32
    %414 = vector.broadcast %cst_92 : f32 to vector<2x16xf32>
    %415 = arith.subf %414, %408 : vector<2x16xf32>
    %416 = arith.mulf %415, %413 : vector<2x16xf32>
    %417 = arith.mulf %408, %358 : vector<2x16xf32>
    %418 = arith.addf %416, %417 : vector<2x16xf32>
    %419 = vector.extract_strided_slice %386 {offsets = [0, 0], sizes = [2, 16], strides = [1, 1]} : vector<2x48xf32> to vector<2x16xf32>
    %420 = vector.extract_strided_slice %392 {offsets = [0, 0], sizes = [2, 16], strides = [1, 1]} : vector<2x48xf32> to vector<2x16xf32>
    %421 = arith.addf %419, %420 : vector<2x16xf32>
    %422 = arith.negf %421 : vector<2x16xf32>
    %423 = math.exp %422 : vector<2x16xf32>
    %cst_93 = arith.constant 1.000000e+00 : f32
    %424 = vector.broadcast %cst_93 : f32 to vector<2x16xf32>
    %425 = arith.addf %424, %423 : vector<2x16xf32>
    %426 = arith.divf %424, %425 : vector<2x16xf32>
    %427 = vector.extract_strided_slice %386 {offsets = [0, 16], sizes = [2, 16], strides = [1, 1]} : vector<2x48xf32> to vector<2x16xf32>
    %428 = vector.extract_strided_slice %392 {offsets = [0, 16], sizes = [2, 16], strides = [1, 1]} : vector<2x48xf32> to vector<2x16xf32>
    %429 = arith.addf %427, %428 : vector<2x16xf32>
    %430 = arith.negf %429 : vector<2x16xf32>
    %431 = math.exp %430 : vector<2x16xf32>
    %cst_94 = arith.constant 1.000000e+00 : f32
    %432 = vector.broadcast %cst_94 : f32 to vector<2x16xf32>
    %433 = arith.addf %432, %431 : vector<2x16xf32>
    %434 = arith.divf %432, %433 : vector<2x16xf32>
    %435 = vector.extract_strided_slice %386 {offsets = [0, 32], sizes = [2, 16], strides = [1, 1]} : vector<2x48xf32> to vector<2x16xf32>
    %436 = vector.extract_strided_slice %392 {offsets = [0, 32], sizes = [2, 16], strides = [1, 1]} : vector<2x48xf32> to vector<2x16xf32>
    %437 = arith.mulf %426, %436 : vector<2x16xf32>
    %438 = arith.addf %435, %437 : vector<2x16xf32>
    %439 = math.tanh %438 : vector<2x16xf32>
    %cst_95 = arith.constant 1.000000e+00 : f32
    %440 = vector.broadcast %cst_95 : f32 to vector<2x16xf32>
    %441 = arith.subf %440, %434 : vector<2x16xf32>
    %442 = arith.mulf %441, %439 : vector<2x16xf32>
    %443 = arith.mulf %434, %361 : vector<2x16xf32>
    %444 = arith.addf %442, %443 : vector<2x16xf32>
    %445 = vector.broadcast %c4_i32 : i32 to vector<2x1xi32>
    %446 = arith.cmpi slt, %445, %0 : vector<2x1xi32>
    %447 = vector.broadcast %378 : i32 to vector<2x1xi32>
    %448 = arith.cmpi slt, %447, %0 : vector<2x1xi32>
    %449 = vector.shape_cast %446 : vector<2x1xi1> to vector<2x1xi1>
    %450 = vector.broadcast %449 : vector<2x1xi1> to vector<2x16xi1>
    %451 = arith.select %450, %418, %358 : vector<2x16xi1>, vector<2x16xf32>
    %452 = vector.shape_cast %448 : vector<2x1xi1> to vector<2x1xi1>
    %453 = vector.broadcast %452 : vector<2x1xi1> to vector<2x16xi1>
    %454 = arith.select %453, %444, %361 : vector<2x16xi1>, vector<2x16xf32>
    %cst_96 = arith.constant 0.000000e+00 : f32
    %455 = vector.shape_cast %446 : vector<2x1xi1> to vector<2x1xi1>
    %456 = vector.broadcast %455 : vector<2x1xi1> to vector<2x16xi1>
    %457 = vector.broadcast %cst_96 : f32 to vector<2x16xf32>
    %458 = arith.select %456, %451, %457 : vector<2x16xi1>, vector<2x16xf32>
    %459 = arith.index_cast %c4_i32 : i32 to index
    %c0_97 = arith.constant 0 : index
    %c0_98 = arith.constant 0 : index
    %460 = vector.load %arg8[%459, %c0_97, %c0_98] : memref<8x2x32xf32, #tpu.memory_space<vmem>>, vector<1x2x16xf32>
    %461 = vector.shape_cast %460 : vector<1x2x16xf32> to vector<2x16xf32>
    %462 = vector.shape_cast %458 : vector<2x16xf32> to vector<1x2x16xf32>
    tpu.vector_store %arg8[%459, %c0_97, %c0_98], %462 {strides = array<i32>} : memref<8x2x32xf32, #tpu.memory_space<vmem>>, vector<1x2x16xf32>,
    %cst_99 = arith.constant 0.000000e+00 : f32
    %463 = vector.shape_cast %448 : vector<2x1xi1> to vector<2x1xi1>
    %464 = vector.broadcast %463 : vector<2x1xi1> to vector<2x16xi1>
    %465 = vector.broadcast %cst_99 : f32 to vector<2x16xf32>
    %466 = arith.select %464, %454, %465 : vector<2x16xi1>, vector<2x16xf32>
    %467 = arith.index_cast %378 : i32 to index
    %c0_100 = arith.constant 0 : index
    %c16_101 = arith.constant 16 : index
    %468 = vector.load %arg8[%467, %c0_100, %c16_101] : memref<8x2x32xf32, #tpu.memory_space<vmem>>, vector<1x2x16xf32>
    %469 = vector.shape_cast %468 : vector<1x2x16xf32> to vector<2x16xf32>
    %470 = vector.shape_cast %466 : vector<2x16xf32> to vector<1x2x16xf32>
    tpu.vector_store %arg8[%467, %c0_100, %c16_101], %470 {strides = array<i32>} : memref<8x2x32xf32, #tpu.memory_space<vmem>>, vector<1x2x16xf32>,
    %c5_i32 = arith.constant 5 : i32
    %c7_i32_102 = arith.constant 7 : i32
    %471 = arith.subi %c7_i32_102, %c5_i32 : i32
    %472 = arith.index_cast %c5_i32 : i32 to index
    %c0_103 = arith.constant 0 : index
    %c0_104 = arith.constant 0 : index
    %473 = vector.load %arg2[%472, %c0_103, %c0_104] : memref<8x2x48xbf16, #tpu.memory_space<vmem>>, vector<1x2x48xbf16>
    %474 = vector.shape_cast %473 : vector<1x2x48xbf16> to vector<2x48xbf16>
    %475 = arith.extf %474 : vector<2x48xbf16> to vector<2x48xf32>
    %476 = arith.index_cast %471 : i32 to index
    %c0_105 = arith.constant 0 : index
    %c0_106 = arith.constant 0 : index
    %477 = vector.load %arg3[%476, %c0_105, %c0_106] : memref<8x2x48xbf16, #tpu.memory_space<vmem>>, vector<1x2x48xbf16>
    %478 = vector.shape_cast %477 : vector<1x2x48xbf16> to vector<2x48xbf16>
    %479 = arith.extf %478 : vector<2x48xbf16> to vector<2x48xf32>
    %cst_107 = arith.constant dense<0.000000e+00> : vector<2x48xf32>
    %480 = tpu.matmul %451, %1, %cst_107 {dimension_numbers = #tpu.dot_dimension_numbers<[1], [0], [0], [1], [0, 0, 1, 1], [], []>} : vector<2x16xf32>, vector<16x48xf32>, vector<2x48xf32> -> vector<2x48xf32>
    %481 = vector.broadcast %3 : vector<1x48xf32> to vector<2x48xf32>
    %482 = arith.addf %480, %481 : vector<2x48xf32>
    %cst_108 = arith.constant dense<0.000000e+00> : vector<2x48xf32>
    %483 = tpu.matmul %454, %2, %cst_108 {dimension_numbers = #tpu.dot_dimension_numbers<[1], [0], [0], [1], [0, 0, 1, 1], [], []>} : vector<2x16xf32>, vector<16x48xf32>, vector<2x48xf32> -> vector<2x48xf32>
    %484 = vector.broadcast %4 : vector<1x48xf32> to vector<2x48xf32>
    %485 = arith.addf %483, %484 : vector<2x48xf32>
    %486 = vector.extract_strided_slice %475 {offsets = [0, 0], sizes = [2, 16], strides = [1, 1]} : vector<2x48xf32> to vector<2x16xf32>
    %487 = vector.extract_strided_slice %482 {offsets = [0, 0], sizes = [2, 16], strides = [1, 1]} : vector<2x48xf32> to vector<2x16xf32>
    %488 = arith.addf %486, %487 : vector<2x16xf32>
    %489 = arith.negf %488 : vector<2x16xf32>
    %490 = math.exp %489 : vector<2x16xf32>
    %cst_109 = arith.constant 1.000000e+00 : f32
    %491 = vector.broadcast %cst_109 : f32 to vector<2x16xf32>
    %492 = arith.addf %491, %490 : vector<2x16xf32>
    %493 = arith.divf %491, %492 : vector<2x16xf32>
    %494 = vector.extract_strided_slice %475 {offsets = [0, 16], sizes = [2, 16], strides = [1, 1]} : vector<2x48xf32> to vector<2x16xf32>
    %495 = vector.extract_strided_slice %482 {offsets = [0, 16], sizes = [2, 16], strides = [1, 1]} : vector<2x48xf32> to vector<2x16xf32>
    %496 = arith.addf %494, %495 : vector<2x16xf32>
    %497 = arith.negf %496 : vector<2x16xf32>
    %498 = math.exp %497 : vector<2x16xf32>
    %cst_110 = arith.constant 1.000000e+00 : f32
    %499 = vector.broadcast %cst_110 : f32 to vector<2x16xf32>
    %500 = arith.addf %499, %498 : vector<2x16xf32>
    %501 = arith.divf %499, %500 : vector<2x16xf32>
    %502 = vector.extract_strided_slice %475 {offsets = [0, 32], sizes = [2, 16], strides = [1, 1]} : vector<2x48xf32> to vector<2x16xf32>
    %503 = vector.extract_strided_slice %482 {offsets = [0, 32], sizes = [2, 16], strides = [1, 1]} : vector<2x48xf32> to vector<2x16xf32>
    %504 = arith.mulf %493, %503 : vector<2x16xf32>
    %505 = arith.addf %502, %504 : vector<2x16xf32>
    %506 = math.tanh %505 : vector<2x16xf32>
    %cst_111 = arith.constant 1.000000e+00 : f32
    %507 = vector.broadcast %cst_111 : f32 to vector<2x16xf32>
    %508 = arith.subf %507, %501 : vector<2x16xf32>
    %509 = arith.mulf %508, %506 : vector<2x16xf32>
    %510 = arith.mulf %501, %451 : vector<2x16xf32>
    %511 = arith.addf %509, %510 : vector<2x16xf32>
    %512 = vector.extract_strided_slice %479 {offsets = [0, 0], sizes = [2, 16], strides = [1, 1]} : vector<2x48xf32> to vector<2x16xf32>
    %513 = vector.extract_strided_slice %485 {offsets = [0, 0], sizes = [2, 16], strides = [1, 1]} : vector<2x48xf32> to vector<2x16xf32>
    %514 = arith.addf %512, %513 : vector<2x16xf32>
    %515 = arith.negf %514 : vector<2x16xf32>
    %516 = math.exp %515 : vector<2x16xf32>
    %cst_112 = arith.constant 1.000000e+00 : f32
    %517 = vector.broadcast %cst_112 : f32 to vector<2x16xf32>
    %518 = arith.addf %517, %516 : vector<2x16xf32>
    %519 = arith.divf %517, %518 : vector<2x16xf32>
    %520 = vector.extract_strided_slice %479 {offsets = [0, 16], sizes = [2, 16], strides = [1, 1]} : vector<2x48xf32> to vector<2x16xf32>
    %521 = vector.extract_strided_slice %485 {offsets = [0, 16], sizes = [2, 16], strides = [1, 1]} : vector<2x48xf32> to vector<2x16xf32>
    %522 = arith.addf %520, %521 : vector<2x16xf32>
    %523 = arith.negf %522 : vector<2x16xf32>
    %524 = math.exp %523 : vector<2x16xf32>
    %cst_113 = arith.constant 1.000000e+00 : f32
    %525 = vector.broadcast %cst_113 : f32 to vector<2x16xf32>
    %526 = arith.addf %525, %524 : vector<2x16xf32>
    %527 = arith.divf %525, %526 : vector<2x16xf32>
    %528 = vector.extract_strided_slice %479 {offsets = [0, 32], sizes = [2, 16], strides = [1, 1]} : vector<2x48xf32> to vector<2x16xf32>
    %529 = vector.extract_strided_slice %485 {offsets = [0, 32], sizes = [2, 16], strides = [1, 1]} : vector<2x48xf32> to vector<2x16xf32>
    %530 = arith.mulf %519, %529 : vector<2x16xf32>
    %531 = arith.addf %528, %530 : vector<2x16xf32>
    %532 = math.tanh %531 : vector<2x16xf32>
    %cst_114 = arith.constant 1.000000e+00 : f32
    %533 = vector.broadcast %cst_114 : f32 to vector<2x16xf32>
    %534 = arith.subf %533, %527 : vector<2x16xf32>
    %535 = arith.mulf %534, %532 : vector<2x16xf32>
    %536 = arith.mulf %527, %454 : vector<2x16xf32>
    %537 = arith.addf %535, %536 : vector<2x16xf32>
    %538 = vector.broadcast %c5_i32 : i32 to vector<2x1xi32>
    %539 = arith.cmpi slt, %538, %0 : vector<2x1xi32>
    %540 = vector.broadcast %471 : i32 to vector<2x1xi32>
    %541 = arith.cmpi slt, %540, %0 : vector<2x1xi32>
    %542 = vector.shape_cast %539 : vector<2x1xi1> to vector<2x1xi1>
    %543 = vector.broadcast %542 : vector<2x1xi1> to vector<2x16xi1>
    %544 = arith.select %543, %511, %451 : vector<2x16xi1>, vector<2x16xf32>
    %545 = vector.shape_cast %541 : vector<2x1xi1> to vector<2x1xi1>
    %546 = vector.broadcast %545 : vector<2x1xi1> to vector<2x16xi1>
    %547 = arith.select %546, %537, %454 : vector<2x16xi1>, vector<2x16xf32>
    %cst_115 = arith.constant 0.000000e+00 : f32
    %548 = vector.shape_cast %539 : vector<2x1xi1> to vector<2x1xi1>
    %549 = vector.broadcast %548 : vector<2x1xi1> to vector<2x16xi1>
    %550 = vector.broadcast %cst_115 : f32 to vector<2x16xf32>
    %551 = arith.select %549, %544, %550 : vector<2x16xi1>, vector<2x16xf32>
    %552 = arith.index_cast %c5_i32 : i32 to index
    %c0_116 = arith.constant 0 : index
    %c0_117 = arith.constant 0 : index
    %553 = vector.load %arg8[%552, %c0_116, %c0_117] : memref<8x2x32xf32, #tpu.memory_space<vmem>>, vector<1x2x16xf32>
    %554 = vector.shape_cast %553 : vector<1x2x16xf32> to vector<2x16xf32>
    %555 = vector.shape_cast %551 : vector<2x16xf32> to vector<1x2x16xf32>
    tpu.vector_store %arg8[%552, %c0_116, %c0_117], %555 {strides = array<i32>} : memref<8x2x32xf32, #tpu.memory_space<vmem>>, vector<1x2x16xf32>,
    %cst_118 = arith.constant 0.000000e+00 : f32
    %556 = vector.shape_cast %541 : vector<2x1xi1> to vector<2x1xi1>
    %557 = vector.broadcast %556 : vector<2x1xi1> to vector<2x16xi1>
    %558 = vector.broadcast %cst_118 : f32 to vector<2x16xf32>
    %559 = arith.select %557, %547, %558 : vector<2x16xi1>, vector<2x16xf32>
    %560 = arith.index_cast %471 : i32 to index
    %c0_119 = arith.constant 0 : index
    %c16_120 = arith.constant 16 : index
    %561 = vector.load %arg8[%560, %c0_119, %c16_120] : memref<8x2x32xf32, #tpu.memory_space<vmem>>, vector<1x2x16xf32>
    %562 = vector.shape_cast %561 : vector<1x2x16xf32> to vector<2x16xf32>
    %563 = vector.shape_cast %559 : vector<2x16xf32> to vector<1x2x16xf32>
    tpu.vector_store %arg8[%560, %c0_119, %c16_120], %563 {strides = array<i32>} : memref<8x2x32xf32, #tpu.memory_space<vmem>>, vector<1x2x16xf32>,
    %c6_i32 = arith.constant 6 : i32
    %c7_i32_121 = arith.constant 7 : i32
    %564 = arith.subi %c7_i32_121, %c6_i32 : i32
    %565 = arith.index_cast %c6_i32 : i32 to index
    %c0_122 = arith.constant 0 : index
    %c0_123 = arith.constant 0 : index
    %566 = vector.load %arg2[%565, %c0_122, %c0_123] : memref<8x2x48xbf16, #tpu.memory_space<vmem>>, vector<1x2x48xbf16>
    %567 = vector.shape_cast %566 : vector<1x2x48xbf16> to vector<2x48xbf16>
    %568 = arith.extf %567 : vector<2x48xbf16> to vector<2x48xf32>
    %569 = arith.index_cast %564 : i32 to index
    %c0_124 = arith.constant 0 : index
    %c0_125 = arith.constant 0 : index
    %570 = vector.load %arg3[%569, %c0_124, %c0_125] : memref<8x2x48xbf16, #tpu.memory_space<vmem>>, vector<1x2x48xbf16>
    %571 = vector.shape_cast %570 : vector<1x2x48xbf16> to vector<2x48xbf16>
    %572 = arith.extf %571 : vector<2x48xbf16> to vector<2x48xf32>
    %cst_126 = arith.constant dense<0.000000e+00> : vector<2x48xf32>
    %573 = tpu.matmul %544, %1, %cst_126 {dimension_numbers = #tpu.dot_dimension_numbers<[1], [0], [0], [1], [0, 0, 1, 1], [], []>} : vector<2x16xf32>, vector<16x48xf32>, vector<2x48xf32> -> vector<2x48xf32>
    %574 = vector.broadcast %3 : vector<1x48xf32> to vector<2x48xf32>
    %575 = arith.addf %573, %574 : vector<2x48xf32>
    %cst_127 = arith.constant dense<0.000000e+00> : vector<2x48xf32>
    %576 = tpu.matmul %547, %2, %cst_127 {dimension_numbers = #tpu.dot_dimension_numbers<[1], [0], [0], [1], [0, 0, 1, 1], [], []>} : vector<2x16xf32>, vector<16x48xf32>, vector<2x48xf32> -> vector<2x48xf32>
    %577 = vector.broadcast %4 : vector<1x48xf32> to vector<2x48xf32>
    %578 = arith.addf %576, %577 : vector<2x48xf32>
    %579 = vector.extract_strided_slice %568 {offsets = [0, 0], sizes = [2, 16], strides = [1, 1]} : vector<2x48xf32> to vector<2x16xf32>
    %580 = vector.extract_strided_slice %575 {offsets = [0, 0], sizes = [2, 16], strides = [1, 1]} : vector<2x48xf32> to vector<2x16xf32>
    %581 = arith.addf %579, %580 : vector<2x16xf32>
    %582 = arith.negf %581 : vector<2x16xf32>
    %583 = math.exp %582 : vector<2x16xf32>
    %cst_128 = arith.constant 1.000000e+00 : f32
    %584 = vector.broadcast %cst_128 : f32 to vector<2x16xf32>
    %585 = arith.addf %584, %583 : vector<2x16xf32>
    %586 = arith.divf %584, %585 : vector<2x16xf32>
    %587 = vector.extract_strided_slice %568 {offsets = [0, 16], sizes = [2, 16], strides = [1, 1]} : vector<2x48xf32> to vector<2x16xf32>
    %588 = vector.extract_strided_slice %575 {offsets = [0, 16], sizes = [2, 16], strides = [1, 1]} : vector<2x48xf32> to vector<2x16xf32>
    %589 = arith.addf %587, %588 : vector<2x16xf32>
    %590 = arith.negf %589 : vector<2x16xf32>
    %591 = math.exp %590 : vector<2x16xf32>
    %cst_129 = arith.constant 1.000000e+00 : f32
    %592 = vector.broadcast %cst_129 : f32 to vector<2x16xf32>
    %593 = arith.addf %592, %591 : vector<2x16xf32>
    %594 = arith.divf %592, %593 : vector<2x16xf32>
    %595 = vector.extract_strided_slice %568 {offsets = [0, 32], sizes = [2, 16], strides = [1, 1]} : vector<2x48xf32> to vector<2x16xf32>
    %596 = vector.extract_strided_slice %575 {offsets = [0, 32], sizes = [2, 16], strides = [1, 1]} : vector<2x48xf32> to vector<2x16xf32>
    %597 = arith.mulf %586, %596 : vector<2x16xf32>
    %598 = arith.addf %595, %597 : vector<2x16xf32>
    %599 = math.tanh %598 : vector<2x16xf32>
    %cst_130 = arith.constant 1.000000e+00 : f32
    %600 = vector.broadcast %cst_130 : f32 to vector<2x16xf32>
    %601 = arith.subf %600, %594 : vector<2x16xf32>
    %602 = arith.mulf %601, %599 : vector<2x16xf32>
    %603 = arith.mulf %594, %544 : vector<2x16xf32>
    %604 = arith.addf %602, %603 : vector<2x16xf32>
    %605 = vector.extract_strided_slice %572 {offsets = [0, 0], sizes = [2, 16], strides = [1, 1]} : vector<2x48xf32> to vector<2x16xf32>
    %606 = vector.extract_strided_slice %578 {offsets = [0, 0], sizes = [2, 16], strides = [1, 1]} : vector<2x48xf32> to vector<2x16xf32>
    %607 = arith.addf %605, %606 : vector<2x16xf32>
    %608 = arith.negf %607 : vector<2x16xf32>
    %609 = math.exp %608 : vector<2x16xf32>
    %cst_131 = arith.constant 1.000000e+00 : f32
    %610 = vector.broadcast %cst_131 : f32 to vector<2x16xf32>
    %611 = arith.addf %610, %609 : vector<2x16xf32>
    %612 = arith.divf %610, %611 : vector<2x16xf32>
    %613 = vector.extract_strided_slice %572 {offsets = [0, 16], sizes = [2, 16], strides = [1, 1]} : vector<2x48xf32> to vector<2x16xf32>
    %614 = vector.extract_strided_slice %578 {offsets = [0, 16], sizes = [2, 16], strides = [1, 1]} : vector<2x48xf32> to vector<2x16xf32>
    %615 = arith.addf %613, %614 : vector<2x16xf32>
    %616 = arith.negf %615 : vector<2x16xf32>
    %617 = math.exp %616 : vector<2x16xf32>
    %cst_132 = arith.constant 1.000000e+00 : f32
    %618 = vector.broadcast %cst_132 : f32 to vector<2x16xf32>
    %619 = arith.addf %618, %617 : vector<2x16xf32>
    %620 = arith.divf %618, %619 : vector<2x16xf32>
    %621 = vector.extract_strided_slice %572 {offsets = [0, 32], sizes = [2, 16], strides = [1, 1]} : vector<2x48xf32> to vector<2x16xf32>
    %622 = vector.extract_strided_slice %578 {offsets = [0, 32], sizes = [2, 16], strides = [1, 1]} : vector<2x48xf32> to vector<2x16xf32>
    %623 = arith.mulf %612, %622 : vector<2x16xf32>
    %624 = arith.addf %621, %623 : vector<2x16xf32>
    %625 = math.tanh %624 : vector<2x16xf32>
    %cst_133 = arith.constant 1.000000e+00 : f32
    %626 = vector.broadcast %cst_133 : f32 to vector<2x16xf32>
    %627 = arith.subf %626, %620 : vector<2x16xf32>
    %628 = arith.mulf %627, %625 : vector<2x16xf32>
    %629 = arith.mulf %620, %547 : vector<2x16xf32>
    %630 = arith.addf %628, %629 : vector<2x16xf32>
    %631 = vector.broadcast %c6_i32 : i32 to vector<2x1xi32>
    %632 = arith.cmpi slt, %631, %0 : vector<2x1xi32>
    %633 = vector.broadcast %564 : i32 to vector<2x1xi32>
    %634 = arith.cmpi slt, %633, %0 : vector<2x1xi32>
    %635 = vector.shape_cast %632 : vector<2x1xi1> to vector<2x1xi1>
    %636 = vector.broadcast %635 : vector<2x1xi1> to vector<2x16xi1>
    %637 = arith.select %636, %604, %544 : vector<2x16xi1>, vector<2x16xf32>
    %638 = vector.shape_cast %634 : vector<2x1xi1> to vector<2x1xi1>
    %639 = vector.broadcast %638 : vector<2x1xi1> to vector<2x16xi1>
    %640 = arith.select %639, %630, %547 : vector<2x16xi1>, vector<2x16xf32>
    %cst_134 = arith.constant 0.000000e+00 : f32
    %641 = vector.shape_cast %632 : vector<2x1xi1> to vector<2x1xi1>
    %642 = vector.broadcast %641 : vector<2x1xi1> to vector<2x16xi1>
    %643 = vector.broadcast %cst_134 : f32 to vector<2x16xf32>
    %644 = arith.select %642, %637, %643 : vector<2x16xi1>, vector<2x16xf32>
    %645 = arith.index_cast %c6_i32 : i32 to index
    %c0_135 = arith.constant 0 : index
    %c0_136 = arith.constant 0 : index
    %646 = vector.load %arg8[%645, %c0_135, %c0_136] : memref<8x2x32xf32, #tpu.memory_space<vmem>>, vector<1x2x16xf32>
    %647 = vector.shape_cast %646 : vector<1x2x16xf32> to vector<2x16xf32>
    %648 = vector.shape_cast %644 : vector<2x16xf32> to vector<1x2x16xf32>
    tpu.vector_store %arg8[%645, %c0_135, %c0_136], %648 {strides = array<i32>} : memref<8x2x32xf32, #tpu.memory_space<vmem>>, vector<1x2x16xf32>,
    %cst_137 = arith.constant 0.000000e+00 : f32
    %649 = vector.shape_cast %634 : vector<2x1xi1> to vector<2x1xi1>
    %650 = vector.broadcast %649 : vector<2x1xi1> to vector<2x16xi1>
    %651 = vector.broadcast %cst_137 : f32 to vector<2x16xf32>
    %652 = arith.select %650, %640, %651 : vector<2x16xi1>, vector<2x16xf32>
    %653 = arith.index_cast %564 : i32 to index
    %c0_138 = arith.constant 0 : index
    %c16_139 = arith.constant 16 : index
    %654 = vector.load %arg8[%653, %c0_138, %c16_139] : memref<8x2x32xf32, #tpu.memory_space<vmem>>, vector<1x2x16xf32>
    %655 = vector.shape_cast %654 : vector<1x2x16xf32> to vector<2x16xf32>
    %656 = vector.shape_cast %652 : vector<2x16xf32> to vector<1x2x16xf32>
    tpu.vector_store %arg8[%653, %c0_138, %c16_139], %656 {strides = array<i32>} : memref<8x2x32xf32, #tpu.memory_space<vmem>>, vector<1x2x16xf32>,
    %c7_i32_140 = arith.constant 7 : i32
    %c7_i32_141 = arith.constant 7 : i32
    %657 = arith.subi %c7_i32_141, %c7_i32_140 : i32
    %658 = arith.index_cast %c7_i32_140 : i32 to index
    %c0_142 = arith.constant 0 : index
    %c0_143 = arith.constant 0 : index
    %659 = vector.load %arg2[%658, %c0_142, %c0_143] : memref<8x2x48xbf16, #tpu.memory_space<vmem>>, vector<1x2x48xbf16>
    %660 = vector.shape_cast %659 : vector<1x2x48xbf16> to vector<2x48xbf16>
    %661 = arith.extf %660 : vector<2x48xbf16> to vector<2x48xf32>
    %662 = arith.index_cast %657 : i32 to index
    %c0_144 = arith.constant 0 : index
    %c0_145 = arith.constant 0 : index
    %663 = vector.load %arg3[%662, %c0_144, %c0_145] : memref<8x2x48xbf16, #tpu.memory_space<vmem>>, vector<1x2x48xbf16>
    %664 = vector.shape_cast %663 : vector<1x2x48xbf16> to vector<2x48xbf16>
    %665 = arith.extf %664 : vector<2x48xbf16> to vector<2x48xf32>
    %cst_146 = arith.constant dense<0.000000e+00> : vector<2x48xf32>
    %666 = tpu.matmul %637, %1, %cst_146 {dimension_numbers = #tpu.dot_dimension_numbers<[1], [0], [0], [1], [0, 0, 1, 1], [], []>} : vector<2x16xf32>, vector<16x48xf32>, vector<2x48xf32> -> vector<2x48xf32>
    %667 = vector.broadcast %3 : vector<1x48xf32> to vector<2x48xf32>
    %668 = arith.addf %666, %667 : vector<2x48xf32>
    %cst_147 = arith.constant dense<0.000000e+00> : vector<2x48xf32>
    %669 = tpu.matmul %640, %2, %cst_147 {dimension_numbers = #tpu.dot_dimension_numbers<[1], [0], [0], [1], [0, 0, 1, 1], [], []>} : vector<2x16xf32>, vector<16x48xf32>, vector<2x48xf32> -> vector<2x48xf32>
    %670 = vector.broadcast %4 : vector<1x48xf32> to vector<2x48xf32>
    %671 = arith.addf %669, %670 : vector<2x48xf32>
    %672 = vector.extract_strided_slice %661 {offsets = [0, 0], sizes = [2, 16], strides = [1, 1]} : vector<2x48xf32> to vector<2x16xf32>
    %673 = vector.extract_strided_slice %668 {offsets = [0, 0], sizes = [2, 16], strides = [1, 1]} : vector<2x48xf32> to vector<2x16xf32>
    %674 = arith.addf %672, %673 : vector<2x16xf32>
    %675 = arith.negf %674 : vector<2x16xf32>
    %676 = math.exp %675 : vector<2x16xf32>
    %cst_148 = arith.constant 1.000000e+00 : f32
    %677 = vector.broadcast %cst_148 : f32 to vector<2x16xf32>
    %678 = arith.addf %677, %676 : vector<2x16xf32>
    %679 = arith.divf %677, %678 : vector<2x16xf32>
    %680 = vector.extract_strided_slice %661 {offsets = [0, 16], sizes = [2, 16], strides = [1, 1]} : vector<2x48xf32> to vector<2x16xf32>
    %681 = vector.extract_strided_slice %668 {offsets = [0, 16], sizes = [2, 16], strides = [1, 1]} : vector<2x48xf32> to vector<2x16xf32>
    %682 = arith.addf %680, %681 : vector<2x16xf32>
    %683 = arith.negf %682 : vector<2x16xf32>
    %684 = math.exp %683 : vector<2x16xf32>
    %cst_149 = arith.constant 1.000000e+00 : f32
    %685 = vector.broadcast %cst_149 : f32 to vector<2x16xf32>
    %686 = arith.addf %685, %684 : vector<2x16xf32>
    %687 = arith.divf %685, %686 : vector<2x16xf32>
    %688 = vector.extract_strided_slice %661 {offsets = [0, 32], sizes = [2, 16], strides = [1, 1]} : vector<2x48xf32> to vector<2x16xf32>
    %689 = vector.extract_strided_slice %668 {offsets = [0, 32], sizes = [2, 16], strides = [1, 1]} : vector<2x48xf32> to vector<2x16xf32>
    %690 = arith.mulf %679, %689 : vector<2x16xf32>
    %691 = arith.addf %688, %690 : vector<2x16xf32>
    %692 = math.tanh %691 : vector<2x16xf32>
    %cst_150 = arith.constant 1.000000e+00 : f32
    %693 = vector.broadcast %cst_150 : f32 to vector<2x16xf32>
    %694 = arith.subf %693, %687 : vector<2x16xf32>
    %695 = arith.mulf %694, %692 : vector<2x16xf32>
    %696 = arith.mulf %687, %637 : vector<2x16xf32>
    %697 = arith.addf %695, %696 : vector<2x16xf32>
    %698 = vector.extract_strided_slice %665 {offsets = [0, 0], sizes = [2, 16], strides = [1, 1]} : vector<2x48xf32> to vector<2x16xf32>
    %699 = vector.extract_strided_slice %671 {offsets = [0, 0], sizes = [2, 16], strides = [1, 1]} : vector<2x48xf32> to vector<2x16xf32>
    %700 = arith.addf %698, %699 : vector<2x16xf32>
    %701 = arith.negf %700 : vector<2x16xf32>
    %702 = math.exp %701 : vector<2x16xf32>
    %cst_151 = arith.constant 1.000000e+00 : f32
    %703 = vector.broadcast %cst_151 : f32 to vector<2x16xf32>
    %704 = arith.addf %703, %702 : vector<2x16xf32>
    %705 = arith.divf %703, %704 : vector<2x16xf32>
    %706 = vector.extract_strided_slice %665 {offsets = [0, 16], sizes = [2, 16], strides = [1, 1]} : vector<2x48xf32> to vector<2x16xf32>
    %707 = vector.extract_strided_slice %671 {offsets = [0, 16], sizes = [2, 16], strides = [1, 1]} : vector<2x48xf32> to vector<2x16xf32>
    %708 = arith.addf %706, %707 : vector<2x16xf32>
    %709 = arith.negf %708 : vector<2x16xf32>
    %710 = math.exp %709 : vector<2x16xf32>
    %cst_152 = arith.constant 1.000000e+00 : f32
    %711 = vector.broadcast %cst_152 : f32 to vector<2x16xf32>
    %712 = arith.addf %711, %710 : vector<2x16xf32>
    %713 = arith.divf %711, %712 : vector<2x16xf32>
    %714 = vector.extract_strided_slice %665 {offsets = [0, 32], sizes = [2, 16], strides = [1, 1]} : vector<2x48xf32> to vector<2x16xf32>
    %715 = vector.extract_strided_slice %671 {offsets = [0, 32], sizes = [2, 16], strides = [1, 1]} : vector<2x48xf32> to vector<2x16xf32>
    %716 = arith.mulf %705, %715 : vector<2x16xf32>
    %717 = arith.addf %714, %716 : vector<2x16xf32>
    %718 = math.tanh %717 : vector<2x16xf32>
    %cst_153 = arith.constant 1.000000e+00 : f32
    %719 = vector.broadcast %cst_153 : f32 to vector<2x16xf32>
    %720 = arith.subf %719, %713 : vector<2x16xf32>
    %721 = arith.mulf %720, %718 : vector<2x16xf32>
    %722 = arith.mulf %713, %640 : vector<2x16xf32>
    %723 = arith.addf %721, %722 : vector<2x16xf32>
    %724 = vector.broadcast %c7_i32_140 : i32 to vector<2x1xi32>
    %725 = arith.cmpi slt, %724, %0 : vector<2x1xi32>
    %726 = vector.broadcast %657 : i32 to vector<2x1xi32>
    %727 = arith.cmpi slt, %726, %0 : vector<2x1xi32>
    %728 = vector.shape_cast %725 : vector<2x1xi1> to vector<2x1xi1>
    %729 = vector.broadcast %728 : vector<2x1xi1> to vector<2x16xi1>
    %730 = arith.select %729, %697, %637 : vector<2x16xi1>, vector<2x16xf32>
    %731 = vector.shape_cast %727 : vector<2x1xi1> to vector<2x1xi1>
    %732 = vector.broadcast %731 : vector<2x1xi1> to vector<2x16xi1>
    %733 = arith.select %732, %723, %640 : vector<2x16xi1>, vector<2x16xf32>
    %cst_154 = arith.constant 0.000000e+00 : f32
    %734 = vector.shape_cast %725 : vector<2x1xi1> to vector<2x1xi1>
    %735 = vector.broadcast %734 : vector<2x1xi1> to vector<2x16xi1>
    %736 = vector.broadcast %cst_154 : f32 to vector<2x16xf32>
    %737 = arith.select %735, %730, %736 : vector<2x16xi1>, vector<2x16xf32>
    %738 = arith.index_cast %c7_i32_140 : i32 to index
    %c0_155 = arith.constant 0 : index
    %c0_156 = arith.constant 0 : index
    %739 = vector.load %arg8[%738, %c0_155, %c0_156] : memref<8x2x32xf32, #tpu.memory_space<vmem>>, vector<1x2x16xf32>
    %740 = vector.shape_cast %739 : vector<1x2x16xf32> to vector<2x16xf32>
    %741 = vector.shape_cast %737 : vector<2x16xf32> to vector<1x2x16xf32>
    tpu.vector_store %arg8[%738, %c0_155, %c0_156], %741 {strides = array<i32>} : memref<8x2x32xf32, #tpu.memory_space<vmem>>, vector<1x2x16xf32>,
    %cst_157 = arith.constant 0.000000e+00 : f32
    %742 = vector.shape_cast %727 : vector<2x1xi1> to vector<2x1xi1>
    %743 = vector.broadcast %742 : vector<2x1xi1> to vector<2x16xi1>
    %744 = vector.broadcast %cst_157 : f32 to vector<2x16xf32>
    %745 = arith.select %743, %733, %744 : vector<2x16xi1>, vector<2x16xf32>
    %746 = arith.index_cast %657 : i32 to index
    %c0_158 = arith.constant 0 : index
    %c16_159 = arith.constant 16 : index
    %747 = vector.load %arg8[%746, %c0_158, %c16_159] : memref<8x2x32xf32, #tpu.memory_space<vmem>>, vector<1x2x16xf32>
    %748 = vector.shape_cast %747 : vector<1x2x16xf32> to vector<2x16xf32>
    %749 = vector.shape_cast %745 : vector<2x16xf32> to vector<1x2x16xf32>
    tpu.vector_store %arg8[%746, %c0_158, %c16_159], %749 {strides = array<i32>} : memref<8x2x32xf32, #tpu.memory_space<vmem>>, vector<1x2x16xf32>,
    %c8_i32 = arith.constant 8 : i32
    return
  }
  func.func @transform_0(%arg0: i32) -> (i32, i32) {
    %c0_i32 = arith.constant 0 : i32
    %c0_i32_0 = arith.constant 0 : i32
    return %arg0, %c0_i32 : i32, i32
  }
  func.func @transform_1(%arg0: i32) -> (i32, i32, i32) {
    %c0_i32 = arith.constant 0 : i32
    %c0_i32_0 = arith.constant 0 : i32
    %c0_i32_1 = arith.constant 0 : i32
    return %c0_i32, %arg0, %c0_i32_0 : i32, i32, i32
  }
  func.func @transform_2(%arg0: i32) -> (i32, i32, i32) {
    %c0_i32 = arith.constant 0 : i32
    %c0_i32_0 = arith.constant 0 : i32
    %c0_i32_1 = arith.constant 0 : i32
    return %c0_i32, %arg0, %c0_i32_0 : i32, i32, i32
  }
  func.func @transform_3(%arg0: i32) -> (i32, i32) {
    %c0_i32 = arith.constant 0 : i32
    %c0_i32_0 = arith.constant 0 : i32
    %c0_i32_1 = arith.constant 0 : i32
    return %c0_i32, %c0_i32_0 : i32, i32
  }
  func.func @transform_4(%arg0: i32) -> (i32, i32) {
    %c0_i32 = arith.constant 0 : i32
    %c0_i32_0 = arith.constant 0 : i32
    %c0_i32_1 = arith.constant 0 : i32
    return %c0_i32, %c0_i32_0 : i32, i32
  }
  func.func @transform_5(%arg0: i32) -> (i32, i32) {
    %c0_i32 = arith.constant 0 : i32
    %c0_i32_0 = arith.constant 0 : i32
    %c0_i32_1 = arith.constant 0 : i32
    return %c0_i32, %c0_i32_0 : i32, i32
  }
  func.func @transform_6(%arg0: i32) -> (i32, i32) {
    %c0_i32 = arith.constant 0 : i32
    %c0_i32_0 = arith.constant 0 : i32
    %c0_i32_1 = arith.constant 0 : i32
    return %c0_i32, %c0_i32_0 : i32, i32
  }
  func.func @transform_7(%arg0: i32) -> (i32, i32, i32) {
    %c0_i32 = arith.constant 0 : i32
    %c0_i32_0 = arith.constant 0 : i32
    %c0_i32_1 = arith.constant 0 : i32
    return %c0_i32, %arg0, %c0_i32_0 : i32, i32, i32
  }
}

</mosaic_0001>

<bundles_post_ra>
// kernel: fian_query_encoder.1
= control target key start
LH: loop header
LB: loop body
LE: loop exit
PB: predicated region body
PF: predicated region fallthrough
CT: control target
= control target key end

     0   :  { %v2614_v0 = vmov 0.0|0.0   ;;  %vm2615_vm0 = vmmov 0   ;;  %v2616_v3 = vmov 0.0   ;;  %v2617_v8 = vmov 1983009808   ;;  %s2618_s11 = smov 96   ;;  %s3242_s4 = inlined_call_operand.vmem [shape: f32[16,48], index: 4, kind: input, shape index: {}]   ;;  %s3243_s3 = inlined_call_operand.vmem [shape: f32[16,48], index: 3, kind: input, shape index: {}]   ;;  %s3244_s6 = inlined_call_operand.vmem [shape: f32[1,48], index: 6, kind: input, shape index: {}]   ;;  %s3245_s5 = inlined_call_operand.vmem [shape: f32[1,48], index: 5, kind: input, shape index: {}]   ;;  %s3246_s2 = inlined_call_operand.vmem [shape: bf16[8,2,48], index: 2, kind: input, shape index: {}]   ;;  %s3247_s1 = inlined_call_operand.vmem [shape: bf16[8,2,48], index: 1, kind: input, shape index: {}]   ;;  %s3248_s0 = inlined_call_operand.vmem [shape: s32[2,1], index: 0, kind: input, shape index: {}]   ;;  %s3249_s7 = inlined_call_operand.vmem [shape: f32[8,2,32], index: 7, kind: output, shape index: {}]  }
   0x1   :  { %2460 = vmatprep.subr.bf16.mxu1 %v2614_v0  ;;  %v29_v1 = vld [vmem:[%s3242_s4] sm:$0xff]  ;;  %v30_v2 = vld [vmem:[%s3242_s4 + $0x8] sm:$0xff]  ;;  %2356 = vmatprep.mubr.msk.f32.mxu1 %vm2615_vm0, %v2616_v3  ;;  %v203_v9 = vunpack.c.l.s4 %v2617_v8  ;;  %v205_v10 = vlaneseq  ;;  %s2619_s16 = smov 32   ;;  %v2620_v42 = vmov 0   ;;  %s2621_s19 = smov 112   ;;  %vm44_vm3 = vcmask 130048  }
   0x2   :  { %v27_v4 = vld [vmem:[%s3243_s3] sm:$0xff]  ;;  %v2675_v5 = vpack.c.bf16 %v30_v2, %v29_v1  ;;  %2457 = vmatprep.subr.bf16.mxu0 %v2614_v0  ;;  %v28_v6 = vld [vmem:[%s3243_s3 + $0x8] sm:$0xff]  ;;  %2349 = vmatprep.mubr.msk.f32.mxu0 %vm2615_vm0, %v2616_v3  ;;  %vm296_vm6 = vcmask 123904   ;;  %s2622_s25 = smov 16  }
   0x3   :  { %v2683_v7 = vpack.c.bf16 %v28_v6, %v27_v4  ;;  %v204_v11 = vunpack.c.0.s8 %v203_v9  ;;  %v206_v12 = vshrl.u32 %v205_v10, 7  ;;  %v2702_v13 = vld [vmem:[%s3244_s6] ss:$0 sm:$0xff]  ;;  %v2237_v24 = vld [vmem:[%s3246_s2 + $0x7] sm:$0x1]  ;;  %2514 = vset.pattern.permute.xlu1 %v2620_v42  ;;  %2515 = vset.pattern.permute.xlu0 %v2620_v42 }
   0x4   :  { %2462 = vmatpush3.bf16.msra.mxu1 %v2675_v5  ;;  %v2707_v14 = vld [vmem:[%s3245_s5] ss:$0 sm:$0xff]  ;;  %v37_v26 = vunpack.c.l.bf16 %v2237_v24 }
   0x5   :  { %2459 = vmatpush3.bf16.msra.mxu0 %v2683_v7  ;;  %2466 = vmatprep.subr.bf16.mxu1 %v2614_v0  ;;  %v2709_v15 = vsub.s32 %v204_v11, %v206_v12  ;;  %v33_v25 = vld [vmem:[%s3247_s1] sm:$0x1] }
   0x6   :  { %2463 = vmatprep.subr.bf16.mxu0 %v2614_v0  ;;  %v34_v27 = vunpack.c.l.bf16 %v33_v25  ;;  %v2729_v43 = vld [vmem:[%s3248_s0] sm:$0x3] }
   0x7   :  { %2357 = vmatmul.mubr.f32.vlgmr.msra.gmra.mrb[0].mxu1 %v2616_v3  ;;  %vm261_vm1 = vcmp.gt.s32.totalorder %v2729_v43, 7  ;;  %vm260_vm2 = vcmp.gt.s32.totalorder %v2729_v43, 0  ;;  %vm543_vm7 = vcmp.gt.s32.totalorder %v2729_v43, 6  ;;  %vm542_vm8 = vcmp.gt.s32.totalorder %v2729_v43, 1 }
   0x8   :  { %2350 = vmatmul.mubr.f32.vlgmr.msra.gmra.mrb[0].mxu0 %v2616_v3  ;;  %2468 = vmatpush3.bf16.msra.mxu1 %v2675_v5  ;;  %v279_v44 = vsel %vm261_vm1, 1, %v2620_v42  ;;  %v262_v51 = vsel %vm260_vm2, 1, %v2620_v42  ;;  %vm827_vm11 = vcmp.gt.s32.totalorder %v2729_v43, 5  ;;  %vm826_vm12 = vcmp.gt.s32.totalorder %v2729_v43, 2 }
   0x9   :  { %2370 = vmatprep.mubr.msk.f32.mxu1 %vm2615_vm0, %v2616_v3  ;;  %2465 = vmatpush3.bf16.msra.mxu0 %v2683_v7  ;;  %vm1111_vm15 = vcmp.gt.s32.totalorder %v2729_v43, 4  ;;  %vm1110_vm1 = vcmp.gt.s32.totalorder %v2729_v43, 3 }
   0xa   :  { %2363 = vmatprep.mubr.msk.f32.mxu0 %vm2615_vm0, %v2616_v3  ;;  %2472 = vmatprep.subr.bf16.mxu1 %v2614_v0 }
   0xb   :  { %2469 = vmatprep.subr.bf16.mxu0 %v2614_v0 }
  0xda   :  { %v190_v16 = vpop.f32.mrb[0].mxu1 }
  0xdb   :  { %v191_v17 = vadd.f32 %v2702_v13, %v190_v16  ;;  %v2358_v18 = vpop.f32.mrb[1].mxu1  ;;  %v114_v19 = vpop.f32.mrb[0].mxu0 }
  0xdc   :  { %v115_v20 = vadd.f32 %v2707_v14, %v114_v19  ;;  %v2351_v21 = vpop.f32.mrb[1].mxu0 }
  0xdd   :  { %v241_v22 = vrot.slane %v191_v17, %v2709_v15  ;;  %v227_v28 = vadd.f32 %v191_v17, %v37_v26  ;;  %v2244_v21 = vld [vmem:[%s3246_s2 + $0x6] sm:$0x1] }
  0xde   :  { %v208_v23 = vrot.slane %v115_v20, %v2709_v15  ;;  %v194_v29 = vadd.f32 %v115_v20, %v34_v27 }
  0xdf   :  { %242 = vrot.lane.b32.xlu0 %v241_v22, %s2618_s11  ;;  %v2241_v30 = vmul.f32 -1.442695, %v227_v28  ;;  %v310_v22 = vunpack.c.l.bf16 %v2244_v21 }
  0xe0   :  { %v2240_v31 = vmul.f32 -1.442695, %v194_v29 }
  0xe1   :  { %2516 = vpow2.f32 %v2241_v30 }
  0xe2   :  { %2518 = vpow2.f32 %v2240_v31 }
  0xe3   :  { %209 = vrot.lane.b32.xlu0 %v208_v23, %s2618_s11  ;;  %v2243_v23 = vld [vmem:[%s3247_s1 + $0x1] sm:$0x1] }
  0xe4   :  { %v307_v25 = vunpack.c.l.bf16 %v2243_v23 }
  0xeb   :  { %v2517_v32 = vpop.eup %2516 }
  0xec   :  { %v2519_v33 = vpop.eup %2518  ;;  %v231_v34 = vadd.f32 1.0, %v2517_v32 }
  0xed   :  { %v198_v35 = vadd.f32 1.0, %v2519_v33 }
  0xee   :  { %2520 = vrcp.f32 %v231_v34 }
  0xef   :  { %2522 = vrcp.f32 %v198_v35 }
  0xf8   :  { %v2521_v36 = vpop.eup %2520 }
  0xf9   :  { %v2523_v39 = vpop.eup %2522  ;;  %v252_v52 = vsub.f32 1.0, %v2521_v36  ;;  %v258_v54 = vmul.f32 0.0, %v2521_v36 }
  0xfa   :  { %v219_v57 = vsub.f32 1.0, %v2523_v39  ;;  %v225_v59 = vmul.f32 0.0, %v2523_v39 }
 0x151   :  { %v243_v37 = vpop.permute.xlu0 %242 }
 0x152   :  { %v245_v38 = vmul.f32 %v2521_v36, %v243_v37 }
 0x154   :  { %247 = vrot.lane.b32.xlu1 %v245_v38, %s2619_s16 }
 0x155   :  { %v210_v40 = vpop.permute.xlu0 %209 }
 0x156   :  { %v212_v41 = vmul.f32 %v2523_v39, %v210_v40 }
 0x158   :  { %214 = vrot.lane.b32.xlu1 %v212_v41, %s2619_s16 }
 0x15c   :  { %281 = vperm.xlu1 %2514, %v279_v44  }
 0x1c6   :  { %v248_v45 = vpop.permute.xlu1 %247 }
 0x1c7   :  { %v250_v46 = vadd.f32 %v248_v45, %v37_v26 }
 0x1c9   :  { %2524 = vtanh.f32 %v250_v46 }
 0x1ca   :  { %v215_v47 = vpop.permute.xlu1 %214 }
 0x1cb   :  { %v217_v48 = vadd.f32 %v215_v47, %v34_v27  ;;  %v561_v47 = vsel %vm543_vm7, 1, %v2620_v42 }
 0x1cd   :  { %2526 = vtanh.f32 %v217_v48 }
 0x1d3   :  { %v2525_v49 = vpop.eup %2524 }
 0x1d4   :  { %254 = vrot.lane.b32.xlu0 %v2525_v49, %s2621_s19 }
 0x1d7   :  { %v2527_v50 = vpop.eup %2526 }
 0x1d8   :  { %221 = vrot.lane.b32.xlu0 %v2527_v50, %s2621_s19  ;;  %v544_v50 = vsel %vm542_vm8, 1, %v2620_v42 }
 0x1db   :  { %v2742_v1 = vpop.permute.xlu1 %281 }
 0x1dc   :  { %264 = vperm.xlu0 %2515, %v262_v51   ;;  %vm283_vm4 = vcmp.eq.s32.totalorder %v2742_v1, 1 }
 0x246   :  { %v255_v53 = vpop.permute.xlu0 %254 }
 0x247   :  { %v257_v55 = vmul.f32 %v255_v53, %v252_v52 }
 0x249   :  { %v259_v56 = vadd.f32 %v258_v54, %v257_v55 }
 0x24a   :  { %v222_v58 = vpop.permute.xlu0 %221 }
 0x24b   :  { %v224_v60 = vmul.f32 %v222_v58, %v219_v57  ;;  %v291_v61 = vrot.slane %v259_v56, %v2709_v15 }
 0x24d   :  { %v226_v62 = vadd.f32 %v225_v59, %v224_v60  ;;  %292 = vrot.lane.b32.xlu1 %v291_v61, %s2621_s19 }
 0x24f   :  { %v274_v63 = vrot.slane %v226_v62, %v2709_v15 }
 0x251   :  { %275 = vrot.lane.b32.xlu1 %v274_v63, %s2621_s19 }
 0x25b   :  { %v2744_v2 = vpop.permute.xlu0 %264 }
 0x25c   :  { %vm266_vm5 = vcmp.eq.s32.totalorder %v2744_v2, 1 }
 0x2bf   :  { %v293_v4 = vpop.permute.xlu1 %292 }
 0x2c0   :  { %v2749_v6 = vsel %vm283_vm4, %v293_v4, 0.0 }
 0x2c1   :  { %2371 = vmatmul.mubr.msk.f32.vlgmr.msra.gmra.mrb[2].mxu1 %vm44_vm3, %v2749_v6  ;;  %v536_v39 = vrot.slane %v2749_v6, %v2709_v15 }
 0x2c2   :  { %2474 = vmatpush3.bf16.msra.mxu1 %v2675_v5  ;;  %2384 = vmatprep.mubr.msk.f32.mxu1 %vm2615_vm0, %v2616_v3 }
 0x2c3   :  { %v276_v8 = vpop.permute.xlu1 %275  ;;  %2478 = vmatprep.subr.bf16.mxu1 %v2614_v0 }
 0x2c4   :  { %v2760_v9 = vsel %vm266_vm5, %v276_v8, 0.0 }
 0x2c5   :  { %297 = vst.msk [vmem:[%s3249_s7] sm:$0x3] %vm296_vm6, %v2760_v9  ;;  %2364 = vmatmul.mubr.msk.f32.vlgmr.msra.gmra.mrb[2].mxu0 %vm44_vm3, %v2760_v9  ;;  %v493_v49 = vrot.slane %v2760_v9, %v2709_v15 }
 0x2c6   :  { %2471 = vmatpush3.bf16.msra.mxu0 %v2683_v7  ;;  %2377 = vmatprep.mubr.msk.f32.mxu0 %vm2615_vm0, %v2616_v3 }
 0x2c7   :  { %2475 = vmatprep.subr.bf16.mxu0 %v2614_v0 }
 0x394   :  { %v452_v10 = vpop.f32.mrb[2].mxu1 }
 0x395   :  { %v453_v11 = vadd.f32 %v2702_v13, %v452_v10  ;;  %v2372_v12 = vpop.f32.mrb[3].mxu1 }
 0x397   :  { %v513_v16 = vrot.slane %v453_v11, %v2709_v15  ;;  %v499_v24 = vadd.f32 %v453_v11, %v310_v22 }
 0x398   :  { %v380_v17 = vpop.f32.mrb[2].mxu0 }
 0x399   :  { %v381_v18 = vadd.f32 %v2707_v14, %v380_v17  ;;  %514 = vrot.lane.b32.xlu1 %v513_v16, %s2618_s11  ;;  %v2365_v19 = vpop.f32.mrb[3].mxu0  ;;  %v2248_v26 = vmul.f32 -1.442695, %v499_v24 }
 0x39b   :  { %v470_v20 = vrot.slane %v381_v18, %v2709_v15  ;;  %v456_v27 = vadd.f32 %v381_v18, %v307_v25  ;;  %2528 = vpow2.f32 %v2248_v26  ;;  %v2252_v26 = vld [vmem:[%s3246_s2 + $0x5] sm:$0x1] }
 0x39d   :  { %471 = vrot.lane.b32.xlu0 %v470_v20, %s2618_s11  ;;  %v2247_v28 = vmul.f32 -1.442695, %v456_v27  ;;  %v593_v27 = vunpack.c.l.bf16 %v2252_v26 }
 0x39f   :  { %2530 = vpow2.f32 %v2247_v28 }
 0x3a5   :  { %v2529_v29 = vpop.eup %2528 }
 0x3a6   :  { %v503_v30 = vadd.f32 1.0, %v2529_v29 }
 0x3a8   :  { %2532 = vrcp.f32 %v503_v30  ;;  %v2251_v30 = vld [vmem:[%s3247_s1 + $0x2] sm:$0x1] }
 0x3a9   :  { %v2531_v31 = vpop.eup %2530 }
 0x3aa   :  { %v460_v32 = vadd.f32 1.0, %v2531_v31  ;;  %v590_v31 = vunpack.c.l.bf16 %v2251_v30 }
 0x3ac   :  { %2534 = vrcp.f32 %v460_v32 }
 0x3b2   :  { %v2533_v33 = vpop.eup %2532 }
 0x3b3   :  { %v524_v52 = vsub.f32 1.0, %v2533_v33 }
 0x3b6   :  { %v2535_v36 = vpop.eup %2534 }
 0x3b7   :  { %v481_v60 = vsub.f32 1.0, %v2535_v36 }
 0x40b   :  { %v515_v34 = vpop.permute.xlu1 %514 }
 0x40c   :  { %v517_v35 = vmul.f32 %v2533_v33, %v515_v34 }
 0x40e   :  { %519 = vrot.lane.b32.xlu1 %v517_v35, %s2619_s16 }
 0x40f   :  { %v472_v37 = vpop.permute.xlu0 %471 }
 0x410   :  { %v474_v38 = vmul.f32 %v2535_v36, %v472_v37 }
 0x412   :  { %476 = vrot.lane.b32.xlu0 %v474_v38, %s2619_s16 }
 0x416   :  { %537 = vrot.lane.b32.xlu0 %v536_v39, %s2622_s25 }
 0x480   :  { %v520_v40 = vpop.permute.xlu1 %519 }
 0x481   :  { %v522_v41 = vadd.f32 %v520_v40, %v310_v22 }
 0x483   :  { %2536 = vtanh.f32 %v522_v41 }
 0x484   :  { %v477_v44 = vpop.permute.xlu0 %476 }
 0x485   :  { %v479_v45 = vadd.f32 %v477_v44, %v307_v25 }
 0x487   :  { %2538 = vtanh.f32 %v479_v45 }
 0x488   :  { %v538_v51 = vpop.permute.xlu0 %537 }
 0x489   :  { %v540_v54 = vmul.f32 %v2533_v33, %v538_v51 }
 0x48d   :  { %v2537_v46 = vpop.eup %2536 }
 0x48e   :  { %526 = vrot.lane.b32.xlu1 %v2537_v46, %s2621_s19 }
 0x491   :  { %v2539_v48 = vpop.eup %2538 }
 0x492   :  { %563 = vperm.xlu1 %2514, %v561_v47   ;;  %483 = vrot.lane.b32.xlu0 %v2539_v48, %s2621_s19 }
 0x496   :  { %494 = vrot.lane.b32.xlu1 %v493_v49, %s2622_s25 }
 0x49a   :  { %546 = vperm.xlu1 %2514, %v544_v50   ;;  %v845_v50 = vsel %vm827_vm11, 1, %v2620_v42 }
 0x500   :  { %v527_v53 = vpop.permute.xlu1 %526 }
 0x501   :  { %v529_v55 = vmul.f32 %v527_v53, %v524_v52 }
 0x503   :  { %v541_v56 = vadd.f32 %v540_v54, %v529_v55  ;;  %v828_v54 = vsel %vm826_vm12, 1, %v2620_v42 }
 0x504   :  { %v484_v59 = vpop.permute.xlu0 %483 }
 0x505   :  { %v573_v57 = vrot.slane %v541_v56, %v2709_v15  ;;  %v486_v62 = vmul.f32 %v484_v59, %v481_v60 }
 0x507   :  { %574 = vrot.lane.b32.xlu0 %v573_v57, %s2621_s19 }
 0x511   :  { %v2801_v58 = vpop.permute.xlu1 %563 }
 0x512   :  { %vm565_vm9 = vcmp.eq.s32.totalorder %v2801_v58, 1 }
 0x515   :  { %v495_v61 = vpop.permute.xlu1 %494 }
 0x516   :  { %v497_v63 = vmul.f32 %v2535_v36, %v495_v61 }
 0x518   :  { %v498_v4 = vadd.f32 %v497_v63, %v486_v62 }
 0x519   :  { %v2820_v12 = vpop.permute.xlu1 %546 }
 0x51a   :  { %v556_v8 = vrot.slane %v498_v4, %v2709_v15  ;;  %vm548_vm10 = vcmp.eq.s32.totalorder %v2820_v12, 1 }
 0x51c   :  { %557 = vrot.lane.b32.xlu0 %v556_v8, %s2621_s19 }
 0x579   :  { %v2806_v10 = vpop.permute.xlu0 %574 }
 0x57a   :  { %v2812_v11 = vsel %vm565_vm9, %v2806_v10, %v2749_v6 }
 0x57b   :  { %2385 = vmatmul.mubr.msk.f32.vlgmr.msra.gmra.mrb[4].mxu1 %vm44_vm3, %v2812_v11  ;;  %v820_v46 = vrot.slane %v2812_v11, %v2709_v15 }
 0x57c   :  { %2480 = vmatpush3.bf16.msra.mxu1 %v2675_v5  ;;  %2398 = vmatprep.mubr.msk.f32.mxu1 %vm2615_vm0, %v2616_v3 }
 0x57d   :  { %2484 = vmatprep.subr.bf16.mxu1 %v2614_v0 }
 0x58e   :  { %v558_v16 = vpop.permute.xlu0 %557 }
 0x58f   :  { %v2826_v17 = vsel %vm548_vm10, %v558_v16, %v2760_v9  ;;  %v578_v18 = vsel %vm548_vm10, %v558_v16, 0.0 }
 0x590   :  { %2249 = vst.msk [vmem:[%s3249_s7 + $0x2] sm:$0x3] %vm296_vm6, %v578_v18  ;;  %2378 = vmatmul.mubr.msk.f32.vlgmr.msra.gmra.mrb[4].mxu0 %vm44_vm3, %v2826_v17  ;;  %v777_v51 = vrot.slane %v2826_v17, %v2709_v15 }
 0x591   :  { %2477 = vmatpush3.bf16.msra.mxu0 %v2683_v7  ;;  %2391 = vmatprep.mubr.msk.f32.mxu0 %vm2615_vm0, %v2616_v3 }
 0x592   :  { %2481 = vmatprep.subr.bf16.mxu0 %v2614_v0 }
 0x64e   :  { %v736_v9 = vpop.f32.mrb[4].mxu1 }
 0x64f   :  { %v737_v19 = vadd.f32 %v2702_v13, %v736_v9  ;;  %v2386_v20 = vpop.f32.mrb[5].mxu1 }
 0x651   :  { %v797_v21 = vrot.slane %v737_v19, %v2709_v15  ;;  %v783_v28 = vadd.f32 %v737_v19, %v593_v27 }
 0x653   :  { %798 = vrot.lane.b32.xlu1 %v797_v21, %s2618_s11  ;;  %v2256_v29 = vmul.f32 -1.442695, %v783_v28 }
 0x655   :  { %2540 = vpow2.f32 %v2256_v29 }
 0x65f   :  { %v2541_v32 = vpop.eup %2540 }
 0x660   :  { %v787_v33 = vadd.f32 1.0, %v2541_v32 }
 0x662   :  { %2542 = vrcp.f32 %v787_v33 }
 0x663   :  { %v663_v22 = vpop.f32.mrb[4].mxu0 }
 0x664   :  { %v664_v23 = vadd.f32 %v2707_v14, %v663_v22  ;;  %v2379_v24 = vpop.f32.mrb[5].mxu0 }
 0x666   :  { %v754_v25 = vrot.slane %v664_v23, %v2709_v15  ;;  %v740_v34 = vadd.f32 %v664_v23, %v590_v31 }
 0x668   :  { %755 = vrot.lane.b32.xlu0 %v754_v25, %s2618_s11  ;;  %v2255_v35 = vmul.f32 -1.442695, %v740_v34  ;;  %v2260_v34 = vld [vmem:[%s3246_s2 + $0x4] sm:$0x1] }
 0x66a   :  { %2544 = vpow2.f32 %v2255_v35  ;;  %v877_v35 = vunpack.c.l.bf16 %v2260_v34 }
 0x66c   :  { %v2543_v36 = vpop.eup %2542 }
 0x66d   :  { %v808_v57 = vsub.f32 1.0, %v2543_v36 }
 0x674   :  { %v2545_v39 = vpop.eup %2544 }
 0x675   :  { %v744_v40 = vadd.f32 1.0, %v2545_v39 }
 0x677   :  { %2546 = vrcp.f32 %v744_v40 }
 0x681   :  { %v2547_v41 = vpop.eup %2546 }
 0x682   :  { %v765_v8 = vsub.f32 1.0, %v2547_v41 }
 0x6c5   :  { %v799_v37 = vpop.permute.xlu1 %798 }
 0x6c6   :  { %v801_v38 = vmul.f32 %v2543_v36, %v799_v37 }
 0x6c8   :  { %803 = vrot.lane.b32.xlu1 %v801_v38, %s2619_s16  ;;  %v2259_v38 = vld [vmem:[%s3247_s1 + $0x3] sm:$0x1] }
 0x6c9   :  { %v874_v39 = vunpack.c.l.bf16 %v2259_v38 }
 0x6da   :  { %v756_v44 = vpop.permute.xlu0 %755 }
 0x6db   :  { %v758_v45 = vmul.f32 %v2547_v41, %v756_v44 }
 0x6dd   :  { %760 = vrot.lane.b32.xlu0 %v758_v45, %s2619_s16 }
 0x6e1   :  { %821 = vrot.lane.b32.xlu0 %v820_v46, %s2622_s25 }
 0x73a   :  { %v804_v47 = vpop.permute.xlu1 %803 }
 0x73b   :  { %v806_v48 = vadd.f32 %v804_v47, %v593_v27 }
 0x73d   :  { %2548 = vtanh.f32 %v806_v48 }
 0x747   :  { %v2549_v49 = vpop.eup %2548 }
 0x748   :  { %810 = vrot.lane.b32.xlu1 %v2549_v49, %s2621_s19 }
 0x74c   :  { %847 = vperm.xlu1 %2514, %v845_v50  }
 0x74f   :  { %v761_v52 = vpop.permute.xlu0 %760 }
 0x750   :  { %v763_v53 = vadd.f32 %v761_v52, %v590_v31  ;;  %778 = vrot.lane.b32.xlu1 %v777_v51, %s2622_s25 }
 0x752   :  { %2550 = vtanh.f32 %v763_v53 }
 0x753   :  { %v822_v56 = vpop.permute.xlu0 %821 }
 0x754   :  { %830 = vperm.xlu1 %2514, %v828_v54   ;;  %v824_v60 = vmul.f32 %v2543_v36, %v822_v56 }
 0x75c   :  { %v2551_v55 = vpop.eup %2550 }
 0x75d   :  { %767 = vrot.lane.b32.xlu0 %v2551_v55, %s2621_s19 }
 0x7ba   :  { %v811_v59 = vpop.permute.xlu1 %810 }
 0x7bb   :  { %v813_v61 = vmul.f32 %v811_v59, %v808_v57  ;;  %v1129_v59 = vsel %vm1111_vm15, 1, %v2620_v42 }
 0x7bd   :  { %v825_v62 = vadd.f32 %v824_v60, %v813_v61 }
 0x7bf   :  { %v857_v63 = vrot.slane %v825_v62, %v2709_v15 }
 0x7c1   :  { %858 = vrot.lane.b32.xlu0 %v857_v63, %s2621_s19  ;;  %v1112_v63 = vsel %vm1110_vm1, 1, %v2620_v42 }
 0x7cb   :  { %v2868_v4 = vpop.permute.xlu1 %847 }
 0x7cc   :  { %vm849_vm13 = vcmp.eq.s32.totalorder %v2868_v4, 1 }
 0x7cf   :  { %v779_v16 = vpop.permute.xlu1 %778  ;;  %v768_v18 = vpop.permute.xlu0 %767 }
 0x7d0   :  { %v781_v9 = vmul.f32 %v2547_v41, %v779_v16  ;;  %v770_v19 = vmul.f32 %v768_v18, %v765_v8 }
 0x7d2   :  { %v782_v20 = vadd.f32 %v781_v9, %v770_v19 }
 0x7d3   :  { %v2887_v24 = vpop.permute.xlu1 %830 }
 0x7d4   :  { %v840_v21 = vrot.slane %v782_v20, %v2709_v15  ;;  %vm832_vm14 = vcmp.eq.s32.totalorder %v2887_v24, 1 }
 0x7d6   :  { %841 = vrot.lane.b32.xlu0 %v840_v21, %s2621_s19 }
 0x833   :  { %v2873_v22 = vpop.permute.xlu0 %858 }
 0x834   :  { %v2879_v23 = vsel %vm849_vm13, %v2873_v22, %v2812_v11 }
 0x835   :  { %2399 = vmatmul.mubr.msk.f32.vlgmr.msra.gmra.mrb[6].mxu1 %vm44_vm3, %v2879_v23  ;;  %v1104_v54 = vrot.slane %v2879_v23, %v2709_v15 }
 0x836   :  { %2486 = vmatpush3.bf16.msra.mxu1 %v2675_v5  ;;  %2412 = vmatprep.mubr.msk.f32.mxu1 %vm2615_vm0, %v2616_v3 }
 0x837   :  { %2490 = vmatprep.subr.bf16.mxu1 %v2614_v0 }
 0x848   :  { %v842_v25 = vpop.permute.xlu0 %841 }
 0x849   :  { %v2893_v11 = vsel %vm832_vm14, %v842_v25, %v2826_v17  ;;  %v862_v26 = vsel %vm832_vm14, %v842_v25, 0.0 }
 0x84a   :  { %2257 = vst.msk [vmem:[%s3249_s7 + $0x4] sm:$0x3] %vm296_vm6, %v862_v26  ;;  %2392 = vmatmul.mubr.msk.f32.vlgmr.msra.gmra.mrb[6].mxu0 %vm44_vm3, %v2893_v11  ;;  %v1061_v60 = vrot.slane %v2893_v11, %v2709_v15 }
 0x84b   :  { %2483 = vmatpush3.bf16.msra.mxu0 %v2683_v7  ;;  %2405 = vmatprep.mubr.msk.f32.mxu0 %vm2615_vm0, %v2616_v3 }
 0x84c   :  { %2487 = vmatprep.subr.bf16.mxu0 %v2614_v0 }
 0x908   :  { %v1020_v17 = vpop.f32.mrb[6].mxu1 }
 0x909   :  { %v1021_v27 = vadd.f32 %v2702_v13, %v1020_v17  ;;  %v2400_v28 = vpop.f32.mrb[7].mxu1 }
 0x90b   :  { %v1081_v29 = vrot.slane %v1021_v27, %v2709_v15  ;;  %v1067_v36 = vadd.f32 %v1021_v27, %v877_v35 }
 0x90d   :  { %1082 = vrot.lane.b32.xlu1 %v1081_v29, %s2618_s11  ;;  %v2264_v37 = vmul.f32 -1.442695, %v1067_v36 }
 0x90f   :  { %2552 = vpow2.f32 %v2264_v37 }
 0x919   :  { %v2553_v40 = vpop.eup %2552 }
 0x91a   :  { %v1071_v41 = vadd.f32 1.0, %v2553_v40 }
 0x91c   :  { %2554 = vrcp.f32 %v1071_v41 }
 0x91d   :  { %v947_v30 = vpop.f32.mrb[6].mxu0 }
 0x91e   :  { %v948_v31 = vadd.f32 %v2707_v14, %v947_v30  ;;  %v2393_v32 = vpop.f32.mrb[7].mxu0 }
 0x920   :  { %v1038_v33 = vrot.slane %v948_v31, %v2709_v15  ;;  %v1024_v44 = vadd.f32 %v948_v31, %v874_v39 }
 0x922   :  { %1039 = vrot.lane.b32.xlu0 %v1038_v33, %s2618_s11  ;;  %v2263_v45 = vmul.f32 -1.442695, %v1024_v44 }
 0x924   :  { %2556 = vpow2.f32 %v2263_v45  ;;  %v2268_v45 = vld [vmem:[%s3246_s2 + $0x3] sm:$0x1] }
 0x926   :  { %v2555_v46 = vpop.eup %2554 }
 0x927   :  { %v1092_v18 = vsub.f32 1.0, %v2555_v46 }
 0x92e   :  { %v2557_v49 = vpop.eup %2556 }
 0x92f   :  { %v1028_v50 = vadd.f32 1.0, %v2557_v49  ;;  %v2267_v49 = vld [vmem:[%s3247_s1 + $0x4] sm:$0x1] }
 0x931   :  { %2558 = vrcp.f32 %v1028_v50  ;;  %v1158_v50 = vunpack.c.l.bf16 %v2267_v49 }
 0x93b   :  { %v2559_v51 = vpop.eup %2558 }
 0x93c   :  { %v1049_v26 = vsub.f32 1.0, %v2559_v51 }
 0x97f   :  { %v1083_v47 = vpop.permute.xlu1 %1082 }
 0x980   :  { %v1085_v48 = vmul.f32 %v2555_v46, %v1083_v47 }
 0x982   :  { %1087 = vrot.lane.b32.xlu1 %v1085_v48, %s2619_s16 }
 0x994   :  { %v1040_v52 = vpop.permute.xlu0 %1039 }
 0x995   :  { %v1042_v53 = vmul.f32 %v2559_v51, %v1040_v52 }
 0x997   :  { %1044 = vrot.lane.b32.xlu0 %v1042_v53, %s2619_s16 }
 0x99b   :  { %1105 = vrot.lane.b32.xlu0 %v1104_v54, %s2622_s25 }
 0x9f4   :  { %v1088_v55 = vpop.permute.xlu1 %1087 }
 0x9f5   :  { %v1090_v56 = vadd.f32 %v1088_v55, %v877_v35 }
 0x9f7   :  { %2560 = vtanh.f32 %v1090_v56 }
 0xa01   :  { %v2561_v57 = vpop.eup %2560 }
 0xa02   :  { %1094 = vrot.lane.b32.xlu1 %v2561_v57, %s2621_s19 }
 0xa06   :  { %1131 = vperm.xlu1 %2514, %v1129_v59  }
 0xa09   :  { %v1045_v61 = vpop.permute.xlu0 %1044 }
 0xa0a   :  { %v1047_v62 = vadd.f32 %v1045_v61, %v874_v39  ;;  %1062 = vrot.lane.b32.xlu1 %v1061_v60, %s2622_s25 }
 0xa0c   :  { %2562 = vtanh.f32 %v1047_v62 }
 0xa0d   :  { %v1106_v16 = vpop.permute.xlu0 %1105 }
 0xa0e   :  { %1114 = vperm.xlu1 %2514, %v1112_v63   ;;  %v1108_v19 = vmul.f32 %v2555_v46, %v1106_v16  ;;  %v1161_v46 = vunpack.c.l.bf16 %v2268_v45 }
 0xa16   :  { %v2563_v8 = vpop.eup %2562 }
 0xa17   :  { %1051 = vrot.lane.b32.xlu0 %v2563_v8, %s2621_s19 }
 0xa74   :  { %v1095_v9 = vpop.permute.xlu1 %1094 }
 0xa75   :  { %v1097_v20 = vmul.f32 %v1095_v9, %v1092_v18 }
 0xa77   :  { %v1109_v21 = vadd.f32 %v1108_v19, %v1097_v20 }
 0xa79   :  { %v1141_v25 = vrot.slane %v1109_v21, %v2709_v15 }
 0xa7b   :  { %1142 = vrot.lane.b32.xlu0 %v1141_v25, %s2621_s19 }
 0xa85   :  { %v2935_v43 = vpop.permute.xlu1 %1131 }
 0xa86   :  { %vm1133_vm2 = vcmp.eq.s32.totalorder %v2935_v43, 1 }
 0xa89   :  { %v1063_v17 = vpop.permute.xlu1 %1062  ;;  %v1052_v42 = vpop.permute.xlu0 %1051 }
 0xa8a   :  { %v1065_v27 = vmul.f32 %v2559_v51, %v1063_v17  ;;  %v1054_v28 = vmul.f32 %v1052_v42, %v1049_v26 }
 0xa8c   :  { %v1066_v29 = vadd.f32 %v1065_v27, %v1054_v28 }
 0xa8d   :  { %v2954_v33 = vpop.permute.xlu1 %1114 }
 0xa8e   :  { %v1124_v30 = vrot.slane %v1066_v29, %v2709_v15  ;;  %vm1116_vm7 = vcmp.eq.s32.totalorder %v2954_v33, 1 }
 0xa90   :  { %1125 = vrot.lane.b32.xlu0 %v1124_v30, %s2621_s19 }
 0xaed   :  { %v2940_v31 = vpop.permute.xlu0 %1142 }
 0xaee   :  { %v2946_v32 = vsel %vm1133_vm2, %v2940_v31, %v2879_v23 }
 0xaef   :  { %2413 = vmatmul.mubr.msk.f32.vlgmr.msra.gmra.mrb[8].mxu1 %vm44_vm3, %v2946_v32  ;;  %v1388_v8 = vrot.slane %v2946_v32, %v2709_v15 }
 0xaf0   :  { %2492 = vmatpush3.bf16.msra.mxu1 %v2675_v5  ;;  %2426 = vmatprep.mubr.msk.f32.mxu1 %vm2615_vm0, %v2616_v3 }
 0xaf1   :  { %2496 = vmatprep.subr.bf16.mxu1 %v2614_v0 }
 0xb02   :  { %v1126_v34 = vpop.permute.xlu0 %1125 }
 0xb03   :  { %v2960_v23 = vsel %vm1116_vm7, %v1126_v34, %v2893_v11  ;;  %v1146_v35 = vsel %vm1116_vm7, %v1126_v34, 0.0 }
 0xb04   :  { %2265 = vst.msk [vmem:[%s3249_s7 + $0x6] sm:$0x3] %vm296_vm6, %v1146_v35  ;;  %2406 = vmatmul.mubr.msk.f32.vlgmr.msra.gmra.mrb[8].mxu0 %vm44_vm3, %v2960_v23  ;;  %v1345_v16 = vrot.slane %v2960_v23, %v2709_v15 }
 0xb05   :  { %2489 = vmatpush3.bf16.msra.mxu0 %v2683_v7  ;;  %2419 = vmatprep.mubr.msk.f32.mxu0 %vm2615_vm0, %v2616_v3 }
 0xb06   :  { %2493 = vmatprep.subr.bf16.mxu0 %v2614_v0 }
 0xbc2   :  { %v1304_v11 = vpop.f32.mrb[8].mxu1 }
 0xbc3   :  { %v1305_v36 = vadd.f32 %v2702_v13, %v1304_v11  ;;  %v2414_v37 = vpop.f32.mrb[9].mxu1 }
 0xbc5   :  { %v1365_v38 = vrot.slane %v1305_v36, %v2709_v15  ;;  %v1351_v47 = vadd.f32 %v1305_v36, %v1161_v46 }
 0xbc7   :  { %1366 = vrot.lane.b32.xlu1 %v1365_v38, %s2618_s11  ;;  %v2272_v48 = vmul.f32 -1.442695, %v1351_v47 }
 0xbc9   :  { %2564 = vpow2.f32 %v2272_v48 }
 0xbd3   :  { %v2565_v51 = vpop.eup %2564 }
 0xbd4   :  { %v1355_v52 = vadd.f32 1.0, %v2565_v51 }
 0xbd6   :  { %2566 = vrcp.f32 %v1355_v52 }
 0xbd7   :  { %v1231_v39 = vpop.f32.mrb[8].mxu0 }
 0xbd8   :  { %v1232_v40 = vadd.f32 %v2707_v14, %v1231_v39  ;;  %v2407_v41 = vpop.f32.mrb[9].mxu0 }
 0xbda   :  { %v1322_v44 = vrot.slane %v1232_v40, %v2709_v15  ;;  %v1308_v53 = vadd.f32 %v1232_v40, %v1158_v50 }
 0xbdc   :  { %1323 = vrot.lane.b32.xlu0 %v1322_v44, %s2618_s11  ;;  %v2271_v54 = vmul.f32 -1.442695, %v1308_v53 }
 0xbde   :  { %2568 = vpow2.f32 %v2271_v54  ;;  %v2275_v54 = vld [vmem:[%s3247_s1 + $0x5] sm:$0x1] }
 0xbe0   :  { %v2567_v55 = vpop.eup %2566 }
 0xbe1   :  { %v1376_v17 = vsub.f32 1.0, %v2567_v55 }
 0xbe8   :  { %v2569_v59 = vpop.eup %2568 }
 0xbe9   :  { %v1312_v60 = vadd.f32 1.0, %v2569_v59 }
 0xbeb   :  { %2570 = vrcp.f32 %v1312_v60 }
 0xbf5   :  { %v2571_v61 = vpop.eup %2570 }
 0xbf6   :  { %v1333_v35 = vsub.f32 1.0, %v2571_v61 }
 0xc39   :  { %v1367_v56 = vpop.permute.xlu1 %1366 }
 0xc3a   :  { %v1369_v57 = vmul.f32 %v2567_v55, %v1367_v56 }
 0xc3c   :  { %1371 = vrot.lane.b32.xlu1 %v1369_v57, %s2619_s16 }
 0xc4e   :  { %v1324_v62 = vpop.permute.xlu0 %1323 }
 0xc4f   :  { %v1326_v63 = vmul.f32 %v2571_v61, %v1324_v62 }
 0xc51   :  { %1328 = vrot.lane.b32.xlu0 %v1326_v63, %s2619_s16 }
 0xc55   :  { %1389 = vrot.lane.b32.xlu0 %v1388_v8, %s2622_s25 }
 0xc59   :  { %1346 = vrot.lane.b32.xlu0 %v1345_v16, %s2622_s25 }
 0xcae   :  { %v1372_v18 = vpop.permute.xlu1 %1371 }
 0xcaf   :  { %v1374_v9 = vadd.f32 %v1372_v18, %v1161_v46 }
 0xcb1   :  { %2572 = vtanh.f32 %v1374_v9 }
 0xcbb   :  { %v2573_v19 = vpop.eup %2572 }
 0xcbc   :  { %1378 = vrot.lane.b32.xlu1 %v2573_v19, %s2621_s19 }
 0xcc3   :  { %v1329_v20 = vpop.permute.xlu0 %1328 }
 0xcc4   :  { %v1331_v21 = vadd.f32 %v1329_v20, %v1158_v50 }
 0xcc6   :  { %2574 = vtanh.f32 %v1331_v21 }
 0xcc7   :  { %v1390_v26 = vpop.permute.xlu0 %1389 }
 0xcc8   :  { %v1392_v27 = vmul.f32 %v2567_v55, %v1390_v26  ;;  %v1428_v55 = vunpack.c.l.bf16 %v2275_v54 }
 0xccb   :  { %v1347_v34 = vpop.permute.xlu0 %1346 }
 0xccc   :  { %v1349_v36 = vmul.f32 %v2571_v61, %v1347_v34 }
 0xcd0   :  { %v2575_v25 = vpop.eup %2574 }
 0xcd1   :  { %1335 = vrot.lane.b32.xlu1 %v2575_v25, %s2621_s19 }
 0xd2e   :  { %v1379_v42 = vpop.permute.xlu1 %1378 }
 0xd2f   :  { %v1381_v28 = vmul.f32 %v1379_v42, %v1376_v17 }
 0xd31   :  { %v1393_v29 = vadd.f32 %v1392_v27, %v1381_v28 }
 0xd33   :  { %v1413_v30 = vrot.slane %v1393_v29, %v2709_v15 }
 0xd35   :  { %1414 = vrot.lane.b32.xlu1 %v1413_v30, %s2621_s19 }
 0xd43   :  { %v1336_v11 = vpop.permute.xlu1 %1335 }
 0xd44   :  { %v1338_v37 = vmul.f32 %v1336_v11, %v1333_v35 }
 0xd46   :  { %v1350_v38 = vadd.f32 %v1349_v36, %v1338_v37 }
 0xd48   :  { %v1401_v39 = vrot.slane %v1350_v38, %v2709_v15 }
 0xd4a   :  { %1402 = vrot.lane.b32.xlu0 %v1401_v39, %s2621_s19 }
 0xda7   :  { %v3000_v40 = vpop.permute.xlu1 %1414 }
 0xda8   :  { %v3006_v41 = vsel %vm1116_vm7, %v3000_v40, %v2946_v32 }
 0xda9   :  { %2427 = vmatmul.mubr.msk.f32.vlgmr.msra.gmra.mrb[10].mxu1 %vm44_vm3, %v3006_v41  ;;  %v1658_v19 = vrot.slane %v3006_v41, %v2709_v15 }
 0xdaa   :  { %2498 = vmatpush3.bf16.msra.mxu1 %v2675_v5  ;;  %2440 = vmatprep.mubr.msk.f32.mxu1 %vm2615_vm0, %v2616_v3 }
 0xdab   :  { %2502 = vmatprep.subr.bf16.mxu1 %v2614_v0 }
 0xdbc   :  { %v3014_v44 = vpop.permute.xlu0 %1402 }
 0xdbd   :  { %v3020_v45 = vsel %vm1133_vm2, %v3014_v44, %v2960_v23  ;;  %v1418_v2 = vsel %vm1133_vm2, %v3014_v44, 0.0 }
 0xdbe   :  { %2420 = vmatmul.mubr.msk.f32.vlgmr.msra.gmra.mrb[10].mxu0 %vm44_vm3, %v3020_v45  ;;  %v1615_v20 = vrot.slane %v3020_v45, %v2709_v15 }
 0xdbf   :  { %2495 = vmatpush3.bf16.msra.mxu0 %v2683_v7  ;;  %2433 = vmatprep.mubr.msk.f32.mxu0 %vm2615_vm0, %v2616_v3 }
 0xdc0   :  { %2499 = vmatprep.subr.bf16.mxu0 %v2614_v0  ;;  %v2276_v0 = vld [vmem:[%s3246_s2 + $0x2] sm:$0x1] }
 0xdc1   :  { %v1431_v52 = vunpack.c.l.bf16 %v2276_v0 }
 0xe7c   :  { %v1574_v32 = vpop.f32.mrb[10].mxu1 }
 0xe7d   :  { %v1575_v46 = vadd.f32 %v2702_v13, %v1574_v32  ;;  %v2428_v47 = vpop.f32.mrb[11].mxu1 }
 0xe7f   :  { %v1635_v48 = vrot.slane %v1575_v46, %v2709_v15  ;;  %v1621_v53 = vadd.f32 %v1575_v46, %v1431_v52 }
 0xe81   :  { %1636 = vrot.lane.b32.xlu1 %v1635_v48, %s2618_s11  ;;  %v2280_v13 = vmul.f32 -1.442695, %v1621_v53 }
 0xe83   :  { %2576 = vpow2.f32 %v2280_v13 }
 0xe8d   :  { %v2577_v56 = vpop.eup %2576 }
 0xe91   :  { %v1501_v23 = vpop.f32.mrb[10].mxu0 }
 0xe92   :  { %v1502_v49 = vadd.f32 %v2707_v14, %v1501_v23  ;;  %v2421_v50 = vpop.f32.mrb[11].mxu0  ;;  %v1625_v14 = vadd.f32 1.0, %v2577_v56 }
 0xe94   :  { %v1592_v51 = vrot.slane %v1502_v49, %v2709_v15  ;;  %v1578_v57 = vadd.f32 %v1502_v49, %v1428_v55  ;;  %2578 = vrcp.f32 %v1625_v14 }
 0xe96   :  { %1593 = vrot.lane.b32.xlu0 %v1592_v51, %s2618_s11  ;;  %v2279_v59 = vmul.f32 -1.442695, %v1578_v57 }
 0xe98   :  { %2580 = vpow2.f32 %v2279_v59  ;;  %v2283_v59 = vld [vmem:[%s3247_s1 + $0x6] sm:$0x1] }
 0xe9e   :  { %v2579_v60 = vpop.eup %2578 }
 0xe9f   :  { %v1646_v29 = vsub.f32 1.0, %v2579_v60 }
 0xea2   :  { %v2581_v63 = vpop.eup %2580 }
 0xea3   :  { %v1582_v8 = vadd.f32 1.0, %v2581_v63 }
 0xea5   :  { %2582 = vrcp.f32 %v1582_v8 }
 0xeaf   :  { %v2583_v16 = vpop.eup %2582 }
 0xeb0   :  { %v1603_v38 = vsub.f32 1.0, %v2583_v16 }
 0xef3   :  { %v1637_v61 = vpop.permute.xlu1 %1636 }
 0xef4   :  { %v1639_v62 = vmul.f32 %v2579_v60, %v1637_v61 }
 0xef6   :  { %1641 = vrot.lane.b32.xlu1 %v1639_v62, %s2619_s16 }
 0xf08   :  { %v1594_v18 = vpop.permute.xlu0 %1593 }
 0xf09   :  { %v1596_v9 = vmul.f32 %v2583_v16, %v1594_v18 }
 0xf0b   :  { %1598 = vrot.lane.b32.xlu0 %v1596_v9, %s2619_s16 }
 0xf0f   :  { %1659 = vrot.lane.b32.xlu0 %v1658_v19, %s2622_s25 }
 0xf13   :  { %1616 = vrot.lane.b32.xlu0 %v1615_v20, %s2622_s25 }
 0xf68   :  { %v1642_v21 = vpop.permute.xlu1 %1641 }
 0xf69   :  { %v1644_v25 = vadd.f32 %v1642_v21, %v1431_v52 }
 0xf6b   :  { %2584 = vtanh.f32 %v1644_v25 }
 0xf75   :  { %v2585_v26 = vpop.eup %2584 }
 0xf76   :  { %1648 = vrot.lane.b32.xlu1 %v2585_v26, %s2621_s19 }
 0xf7d   :  { %v1599_v17 = vpop.permute.xlu0 %1598 }
 0xf7e   :  { %v1601_v42 = vadd.f32 %v1599_v17, %v1428_v55  ;;  %v2284_v55 = vld [vmem:[%s3246_s2 + $0x1] sm:$0x1] }
 0xf7f   :  { %v1701_v56 = vunpack.c.l.bf16 %v2284_v55 }
 0xf80   :  { %2586 = vtanh.f32 %v1601_v42 }
 0xf81   :  { %v1660_v28 = vpop.permute.xlu0 %1659 }
 0xf82   :  { %v1662_v34 = vmul.f32 %v2579_v60, %v1660_v28  ;;  %v1698_v60 = vunpack.c.l.bf16 %v2283_v59 }
 0xf85   :  { %v1617_v37 = vpop.permute.xlu0 %1616 }
 0xf86   :  { %v1619_v32 = vmul.f32 %v2583_v16, %v1617_v37 }
 0xf8a   :  { %v2587_v27 = vpop.eup %2586 }
 0xf8b   :  { %1605 = vrot.lane.b32.xlu1 %v2587_v27, %s2621_s19 }
 0xfe8   :  { %v1649_v30 = vpop.permute.xlu1 %1648 }
 0xfe9   :  { %v1651_v35 = vmul.f32 %v1649_v30, %v1646_v29 }
 0xfeb   :  { %v1663_v11 = vadd.f32 %v1662_v34, %v1651_v35 }
 0xfed   :  { %v1683_v36 = vrot.slane %v1663_v11, %v2709_v15 }
 0xfef   :  { %1684 = vrot.lane.b32.xlu1 %v1683_v36, %s2621_s19 }
 0xffd   :  { %v1606_v39 = vpop.permute.xlu1 %1605 }
 0xffe   :  { %v1608_v46 = vmul.f32 %v1606_v39, %v1603_v38 }
0x1000   :  { %v1620_v47 = vadd.f32 %v1619_v32, %v1608_v46 }
0x1002   :  { %v1671_v48 = vrot.slane %v1620_v47, %v2709_v15 }
0x1004   :  { %1672 = vrot.lane.b32.xlu0 %v1671_v48, %s2621_s19 }
0x1061   :  { %v3054_v23 = vpop.permute.xlu1 %1684 }
0x1062   :  { %v3060_v49 = vsel %vm832_vm14, %v3054_v23, %v3006_v41  ;;  %v3083_v41 = vld [vmem:[%s3244_s6] ss:$0 sm:$0xff] }
0x1063   :  { %2441 = vmatmul.mubr.msk.f32.vlgmr.msra.gmra.mrb[12].mxu1 %vm44_vm3, %v3060_v49  ;;  %v1928_v17 = vrot.slane %v3060_v49, %v2709_v15 }
0x1064   :  { %2504 = vmatpush3.bf16.msra.mxu1 %v2675_v5  ;;  %2454 = vmatprep.mubr.msk.f32.mxu1 %vm2615_vm0, %v2616_v3 }
0x1076   :  { %v3067_v50 = vpop.permute.xlu0 %1672 }
0x1077   :  { %v3073_v51 = vsel %vm849_vm13, %v3067_v50, %v3020_v45 }
0x1078   :  { %2434 = vmatmul.mubr.msk.f32.vlgmr.msra.gmra.mrb[12].mxu0 %vm44_vm3, %v3073_v51  ;;  %v1885_v42 = vrot.slane %v3073_v51, %v2709_v15 }
0x1079   :  { %2501 = vmatpush3.bf16.msra.mxu0 %v2683_v7  ;;  %2447 = vmatprep.mubr.msk.f32.mxu0 %vm2615_vm0, %v2616_v3  ;;  %v3091_v7 = vld [vmem:[%s3245_s5] ss:$0 sm:$0xff]  ;;  %vm303_vm0 = vcmask 255104  }
0x1136   :  { %v1844_v5 = vpop.f32.mrb[12].mxu1 }
0x1137   :  { %v1845_v0 = vadd.f32 %v3083_v41, %v1844_v5  ;;  %v2442_v52 = vpop.f32.mrb[13].mxu1 }
0x1139   :  { %v1905_v45 = vrot.slane %v1845_v0, %v2709_v15  ;;  %v1891_v14 = vadd.f32 %v1845_v0, %v1701_v56 }
0x113b   :  { %1906 = vrot.lane.b32.xlu1 %v1905_v45, %s2618_s11  ;;  %v2288_v57 = vmul.f32 -1.442695, %v1891_v14 }
0x113d   :  { %2588 = vpow2.f32 %v2288_v57 }
0x1147   :  { %v2589_v61 = vpop.eup %2588 }
0x1148   :  { %v1895_v62 = vadd.f32 1.0, %v2589_v61 }
0x114a   :  { %2590 = vrcp.f32 %v1895_v62 }
0x114b   :  { %v1771_v53 = vpop.f32.mrb[12].mxu0 }
0x114c   :  { %v1772_v3 = vadd.f32 %v3091_v7, %v1771_v53  ;;  %v2435_v13 = vpop.f32.mrb[13].mxu0 }
0x114e   :  { %v1862_v54 = vrot.slane %v1772_v3, %v2709_v15  ;;  %v1848_v63 = vadd.f32 %v1772_v3, %v1698_v60 }
0x1150   :  { %1863 = vrot.lane.b32.xlu0 %v1862_v54, %s2618_s11  ;;  %v2287_v8 = vmul.f32 -1.442695, %v1848_v63 }
0x1152   :  { %2592 = vpow2.f32 %v2287_v8 }
0x1154   :  { %v2591_v16 = vpop.eup %2590 }
0x1155   :  { %v1916_v36 = vsub.f32 1.0, %v2591_v16 }
0x115c   :  { %v2593_v19 = vpop.eup %2592 }
0x115d   :  { %v1852_v20 = vadd.f32 1.0, %v2593_v19 }
0x115f   :  { %2594 = vrcp.f32 %v1852_v20 }
0x1169   :  { %v2595_v21 = vpop.eup %2594 }
0x116a   :  { %v1873_v48 = vsub.f32 1.0, %v2595_v21 }
0x11ad   :  { %v1907_v18 = vpop.permute.xlu1 %1906 }
0x11ae   :  { %v1909_v9 = vmul.f32 %v2591_v16, %v1907_v18 }
0x11b0   :  { %1911 = vrot.lane.b32.xlu1 %v1909_v9, %s2619_s16 }
0x11c2   :  { %v1864_v25 = vpop.permute.xlu0 %1863 }
0x11c3   :  { %v1866_v26 = vmul.f32 %v2595_v21, %v1864_v25 }
0x11c5   :  { %1868 = vrot.lane.b32.xlu0 %v1866_v26, %s2619_s16 }
0x11c9   :  { %1929 = vrot.lane.b32.xlu0 %v1928_v17, %s2622_s25 }
0x11cd   :  { %1886 = vrot.lane.b32.xlu0 %v1885_v42, %s2622_s25 }
0x1222   :  { %v1912_v27 = vpop.permute.xlu1 %1911 }
0x1223   :  { %v1914_v28 = vadd.f32 %v1912_v27, %v1701_v56 }
0x1225   :  { %2596 = vtanh.f32 %v1914_v28 }
0x122f   :  { %v2597_v29 = vpop.eup %2596 }
0x1230   :  { %1918 = vrot.lane.b32.xlu1 %v2597_v29, %s2621_s19 }
0x1237   :  { %v1869_v30 = vpop.permute.xlu0 %1868 }
0x1238   :  { %v1871_v34 = vadd.f32 %v1869_v30, %v1698_v60 }
0x123a   :  { %2598 = vtanh.f32 %v1871_v34 }
0x123b   :  { %v1930_v11 = vpop.permute.xlu0 %1929 }
0x123c   :  { %v1932_v38 = vmul.f32 %v2591_v16, %v1930_v11  ;;  %v2291_v16 = vld [vmem:[%s3247_s1 + $0x7] sm:$0x1]  ;;  %v1690_v11 = vsel %vm832_vm14, %v3054_v23, 0.0  ;;  %v1688_v23 = vsel %vm849_vm13, %v3067_v50, 0.0 }
0x123d   :  { %v1968_v18 = vunpack.c.l.bf16 %v2291_v16 }
0x123f   :  { %v1887_v47 = vpop.permute.xlu0 %1886 }
0x1240   :  { %v1889_v0 = vmul.f32 %v2595_v21, %v1887_v47 }
0x1244   :  { %v2599_v35 = vpop.eup %2598 }
0x1245   :  { %1875 = vrot.lane.b32.xlu1 %v2599_v35, %s2621_s19  ;;  %v865_v35 = vsel %vm849_vm13, %v2873_v22, 0.0 }
0x12a2   :  { %v1919_v37 = vpop.permute.xlu1 %1918 }
0x12a3   :  { %v1921_v39 = vmul.f32 %v1919_v37, %v1916_v36 }
0x12a5   :  { %v1933_v32 = vadd.f32 %v1932_v38, %v1921_v39 }
0x12a7   :  { %v1953_v46 = vrot.slane %v1933_v32, %v2709_v15 }
0x12a9   :  { %1954 = vrot.lane.b32.xlu1 %v1953_v46, %s2621_s19 }
0x12b7   :  { %v1876_v5 = vpop.permute.xlu1 %1875 }
0x12b8   :  { %v1878_v52 = vmul.f32 %v1876_v5, %v1873_v48 }
0x12ba   :  { %v1890_v45 = vadd.f32 %v1889_v0, %v1878_v52 }
0x12bc   :  { %v1941_v53 = vrot.slane %v1890_v45, %v2709_v15 }
0x12be   :  { %1942 = vrot.lane.b32.xlu0 %v1941_v53, %s2621_s19  ;;  %v581_v53 = vsel %vm565_vm9, %v2806_v10, 0.0 }
0x131b   :  { %v3116_v3 = vpop.permute.xlu1 %1954 }
0x131c   :  { %v1957_v13 = vsel %vm548_vm10, %v3116_v3, %v3060_v49  ;;  %v1960_v10 = vsel %vm548_vm10, %v3116_v3, 0.0 }
0x131d   :  { %2455 = vmatmul.mubr.msk.f32.vlgmr.msra.gmra.mrb[14].mxu1 %vm44_vm3, %v1957_v13  ;;  %v2197_v30 = vrot.slane %v1957_v13, %v2709_v15  ;;  %v1149_v13 = vsel %vm1133_vm2, %v2940_v31, 0.0 }
0x1330   :  { %v3123_v54 = vpop.permute.xlu0 %1942 }
0x1331   :  { %v1945_v55 = vsel %vm565_vm9, %v3123_v54, %v3073_v51  ;;  %v1969_v51 = vld [vmem:[%s3246_s2] sm:$0x1] }
0x1332   :  { %2448 = vmatmul.mubr.msk.f32.vlgmr.msra.gmra.mrb[14].mxu0 %vm44_vm3, %v1945_v55  ;;  %v1970_v63 = vunpack.c.l.bf16 %v1969_v51  ;;  %v2154_v34 = vrot.slane %v1945_v55, %v2709_v15  ;;  %v1420_v55 = vsel %vm1116_vm7, %v3000_v40, 0.0 }
0x13f0   :  { %v2113_v56 = vpop.f32.mrb[14].mxu1 }
0x13f1   :  { %v2114_v14 = vadd.f32 %v3083_v41, %v2113_v56  ;;  %v2456_v57 = vpop.f32.mrb[15].mxu1 }
0x13f3   :  { %v2174_v59 = vrot.slane %v2114_v14, %v2709_v15  ;;  %v2160_v8 = vadd.f32 %v2114_v14, %v1970_v63 }
0x13f5   :  { %2175 = vrot.lane.b32.xlu1 %v2174_v59, %s2618_s11  ;;  %v2295_v41 = vmul.f32 -1.442695, %v2160_v8 }
0x13f7   :  { %2600 = vpow2.f32 %v2295_v41 }
0x1401   :  { %v2601_v9 = vpop.eup %2600 }
0x1405   :  { %v2040_v49 = vpop.f32.mrb[14].mxu0 }
0x1406   :  { %v2041_v60 = vadd.f32 %v3091_v7, %v2040_v49  ;;  %v2449_v61 = vpop.f32.mrb[15].mxu0  ;;  %v2164_v7 = vadd.f32 1.0, %v2601_v9 }
0x1407   :  { %v1958_v61 = vsel %vm565_vm9, %v3123_v54, 0.0 }
0x1408   :  { %v2131_v62 = vrot.slane %v2041_v60, %v2709_v15  ;;  %v2117_v19 = vadd.f32 %v2041_v60, %v1968_v18  ;;  %2602 = vrcp.f32 %v2164_v7 }
0x140a   :  { %2132 = vrot.lane.b32.xlu0 %v2131_v62, %s2618_s11  ;;  %v2294_v20 = vmul.f32 -1.442695, %v2117_v19 }
0x140c   :  { %2604 = vpow2.f32 %v2294_v20 }
0x1412   :  { %v2603_v21 = vpop.eup %2602 }
0x1413   :  { %v2185_v5 = vsub.f32 1.0, %v2603_v21 }
0x1416   :  { %v2605_v17 = vpop.eup %2604 }
0x1417   :  { %v2121_v42 = vadd.f32 1.0, %v2605_v17 }
0x1419   :  { %2606 = vrcp.f32 %v2121_v42 }
0x1423   :  { %v2607_v27 = vpop.eup %2606 }
0x1424   :  { %v2142_v56 = vsub.f32 1.0, %v2607_v27 }
0x1467   :  { %v2176_v25 = vpop.permute.xlu1 %2175 }
0x1468   :  { %v2178_v26 = vmul.f32 %v2603_v21, %v2176_v25 }
0x146a   :  { %2180 = vrot.lane.b32.xlu1 %v2178_v26, %s2619_s16 }
0x147c   :  { %v2133_v28 = vpop.permute.xlu0 %2132 }
0x147d   :  { %v2135_v29 = vmul.f32 %v2607_v27, %v2133_v28 }
0x147f   :  { %2137 = vrot.lane.b32.xlu0 %v2135_v29, %s2619_s16 }
0x1483   :  { %2198 = vrot.lane.b32.xlu0 %v2197_v30, %s2622_s25 }
0x1487   :  { %2155 = vrot.lane.b32.xlu0 %v2154_v34, %s2622_s25 }
0x148b   :  { %299 = vrot.lane.b32.xlu0 %v2749_v6, %s2622_s25 }
0x148f   :  { %867 = vrot.lane.b32.xlu0 %v865_v35, %s2622_s25 }
0x1493   :  { %1692 = vrot.lane.b32.xlu0 %v1690_v11, %s2622_s25 }
0x14dc   :  { %v2181_v36 = vpop.permute.xlu1 %2180 }
0x14dd   :  { %v2183_v37 = vadd.f32 %v2181_v36, %v1970_v63 }
0x14df   :  { %2608 = vtanh.f32 %v2183_v37 }
0x14e9   :  { %v2609_v38 = vpop.eup %2608 }
0x14ea   :  { %2187 = vrot.lane.b32.xlu1 %v2609_v38, %s2621_s19 }
0x14f1   :  { %v2138_v39 = vpop.permute.xlu0 %2137 }
0x14f2   :  { %v2140_v6 = vadd.f32 %v2138_v39, %v1968_v18 }
0x14f4   :  { %2610 = vtanh.f32 %v2140_v6 }
0x14f5   :  { %v2199_v32 = vpop.permute.xlu0 %2198 }
0x14f6   :  { %v2201_v4 = vmul.f32 %v2603_v21, %v2199_v32 }
0x14f9   :  { %v2156_v46 = vpop.permute.xlu0 %2155 }
0x14fa   :  { %v2158_v57 = vmul.f32 %v2607_v27, %v2156_v46 }
0x14fd   :  { %v300_v22 = vpop.permute.xlu0 %299 }
0x14fe   :  { %v2611_v47 = vpop.eup %2610  ;;  %2242 = vst.msk [vmem:[%s3249_s7 + $0xe] sm:$0x3] %vm303_vm0, %v300_v22 }
0x14ff   :  { %2144 = vrot.lane.b32.xlu1 %v2611_v47, %s2621_s19 }
0x1501   :  { %v868_v24 = vpop.permute.xlu0 %867 }
0x1502   :  { %2258 = vst.msk [vmem:[%s3249_s7 + $0xa] sm:$0x3] %vm303_vm0, %v868_v24 }
0x1503   :  { %2281 = vst.msk [vmem:[%s3249_s7 + $0xa] sm:$0x3] %vm296_vm6, %v1688_v23 }
0x1505   :  { %v1693_v48 = vpop.permute.xlu0 %1692 }
0x1506   :  { %2282 = vst.msk [vmem:[%s3249_s7 + $0x4] sm:$0x3] %vm303_vm0, %v1693_v48 }
0x155c   :  { %v2188_v0 = vpop.permute.xlu1 %2187 }
0x155d   :  { %v2190_v50 = vmul.f32 %v2188_v0, %v2185_v5 }
0x155f   :  { %v2202_v52 = vadd.f32 %v2201_v4, %v2190_v50 }
0x1561   :  { %v2223_v45 = vrot.slane %v2202_v52, %v2709_v15 }
0x1563   :  { %2224 = vrot.lane.b32.xlu1 %v2223_v45, %s2621_s19 }
0x1567   :  { %583 = vrot.lane.b32.xlu1 %v581_v53, %s2622_s25 }
0x156b   :  { %1151 = vrot.lane.b32.xlu1 %v1149_v13, %s2622_s25 }
0x156f   :  { %1422 = vrot.lane.b32.xlu1 %v1420_v55, %s2622_s25 }
0x1571   :  { %v2145_v14 = vpop.permute.xlu1 %2144 }
0x1572   :  { %v2147_v59 = vmul.f32 %v2145_v14, %v2142_v56 }
0x1573   :  { %1962 = vrot.lane.b32.xlu1 %v1960_v10, %s2622_s25 }
0x1574   :  { %v2159_v49 = vadd.f32 %v2158_v57, %v2147_v59 }
0x1576   :  { %v2210_v31 = vrot.slane %v2159_v49, %v2709_v15 }
0x1578   :  { %2211 = vrot.lane.b32.xlu0 %v2210_v31, %s2621_s19 }
0x15d5   :  { %v2225_v60 = vpop.permute.xlu1 %2224 }
0x15d6   :  { %v2227_v33 = vsel %vm266_vm5, %v2225_v60, 0.0 }
0x15d7   :  { %2229 = vrot.lane.b32.xlu0 %v2227_v33, %s2622_s25 }
0x15d9   :  { %v584_v40 = vpop.permute.xlu1 %583 }
0x15da   :  { %2250 = vst.msk [vmem:[%s3249_s7 + $0xc] sm:$0x3] %vm303_vm0, %v584_v40 }
0x15db   :  { %2289 = vst.msk [vmem:[%s3249_s7 + $0xc] sm:$0x3] %vm296_vm6, %v1958_v61 }
0x15dd   :  { %v1152_v15 = vpop.permute.xlu1 %1151 }
0x15de   :  { %2266 = vst.msk [vmem:[%s3249_s7 + $0x8] sm:$0x3] %vm303_vm0, %v1152_v15 }
0x15df   :  { %2273 = vst.msk [vmem:[%s3249_s7 + $0x8] sm:$0x3] %vm296_vm6, %v1418_v2 }
0x15e1   :  { %v1423_v58 = vpop.permute.xlu1 %1422 }
0x15e2   :  { %2274 = vst.msk [vmem:[%s3249_s7 + $0x6] sm:$0x3] %vm303_vm0, %v1423_v58 }
0x15e5   :  { %v1963_v12 = vpop.permute.xlu1 %1962 }
0x15e6   :  { %2290 = vst.msk [vmem:[%s3249_s7 + $0x2] sm:$0x3] %vm303_vm0, %v1963_v12 }
0x15ea   :  { %v2212_v43 = vpop.permute.xlu0 %2211 }
0x15eb   :  { %v2214_v44 = vsel %vm283_vm4, %v2212_v43, 0.0 }
0x15ec   :  { %2296 = vst.msk [vmem:[%s3249_s7 + $0xe] sm:$0x3] %vm296_vm6, %v2214_v44 }
0x1649   :  { %v2230_v3 = vpop.permute.xlu0 %2229 }
0x164a   :  { %2232 = vst.msk [vmem:[%s3249_s7] sm:$0x3] %vm303_vm0, %v2230_v3 }

</bundles_post_ra>
